<compile_context>
chip_gen: v7x
topology: tpu7x:2x2x1
jax: 0.10.0
libtpu: 0.0.40
codegen_flags: <defaults>
</compile_context>

<pallas_src>
import jax
import jax.numpy as jnp
from jax import lax
from jax.experimental import pallas as pl
from jax.experimental.pallas import tpu as pltpu

H = 64          # hidden size
F = 15          # model input feature size
F_PAD = 16      # feature dim zero-padded to 16 (clean bf16 K tiling)
G = 4 * H       # gate width (i, f, g, o)


def _round_up(n, m):
    return (n + m - 1) // m * m


# --------------------------------------------------------------------------- #
# Kernel
# --------------------------------------------------------------------------- #
def _lstm_kernel(x_ref,      # (Tc, Bt, F_PAD) f32  time-chunk of the input
                 w_ih1_ref,  # (F_PAD, 4H) bf16
                 w_hh1_ref,  # (H, 4H)     bf16
                 b1_ref,     # (1, 4H)     f32   b_ih1 + b_hh1
                 w2_ref,     # (2H, 4H)    bf16  [W_ih2^T ; W_hh2^T]
                 b2_ref,     # (1, 4H)     f32   b_ih2 + b_hh2
                 w_fc_ref,   # (8, H)      f32   fc weight replicated on sublanes
                 b_fc_ref,   # (1, 1)      f32
                 out_ref,    # (1, 1, Bt)  f32   lane-dense output block
                 g_ref,      # scratch (Tc, Bt, 4H) bf16  layer-1 gate slab
                 carry_ref): # scratch (4, Bt, H)   f32   h1, c1, h2, c2
    Tc, Bt, Fp = x_ref.shape
    t_chunk = pl.program_id(1)

    # Zero the recurrent carries at the start of each batch tile's time sweep.
    @pl.when(t_chunk == 0)
    def _():
        carry_ref[...] = jnp.zeros_like(carry_ref)

    w_hh1 = w_hh1_ref[...]                                   # bf16
    w2 = w2_ref[...]                                         # bf16
    b2 = jnp.broadcast_to(b2_ref[...], (Bt, G))              # hoisted broadcast

    # ---- Layer-1 input->hidden gates for this chunk: one big bf16 MXU matmul.
    x_flat = x_ref[...].reshape(Tc * Bt, Fp).astype(jnp.bfloat16)
    g1 = jnp.dot(x_flat, w_ih1_ref[...],
                 preferred_element_type=jnp.float32) + b1_ref[...]
    g_ref[...] = g1.reshape(Tc, Bt, G).astype(jnp.bfloat16)

    def gate_math(gates, c):
        # i and f are adjacent columns and both sigmoid -> one full-vreg EUP op.
        sig_if = jax.nn.sigmoid(gates[:, 0:2 * H])
        i = sig_if[:, 0:H]
        f = sig_if[:, H:2 * H]
        g = jnp.tanh(gates[:, 2 * H:3 * H])
        o = jax.nn.sigmoid(gates[:, 3 * H:4 * H])
        c_new = f * c + i * g
        h_new = o * jnp.tanh(c_new)
        return h_new, c_new

    # ---- Fused two-layer recurrence over this time chunk. -------------------
    # TODO(synk): hold w_hh1 / w2 resident in the MXU across the loop via
    # pltpu.matmul_push_rhs / matmul_acc_lhs / matmul_pop to skip per-step RHS
    # re-pushes (moderate win, after the structural changes above).
    def step(t, carry):
        h1, c1, h2, c2 = carry
        # Layer 1: precomputed input gates + recurrent dot (bf16 MXU, f32 acc).
        gates1 = g_ref[t].astype(jnp.float32) + jnp.dot(
            h1.astype(jnp.bfloat16), w_hh1, preferred_element_type=jnp.float32)
        h1, c1 = gate_math(gates1, c1)
        # Layer 2: one K=128 dot on [h1_t | h2_{t-1}] (fills the MXU contraction).
        hcat = jnp.concatenate([h1, h2], axis=-1).astype(jnp.bfloat16)
        gates2 = jnp.dot(hcat, w2, preferred_element_type=jnp.float32) + b2
        h2, c2 = gate_math(gates2, c2)
        return h1, c1, h2, c2

    # Fused body is ~2x the old per-layer body: unroll=2 keeps LLO visibility
    # without blowing vreg pressure; tiny chunks fully unroll.
    unroll = True if Tc <= 8 else 2
    carry0 = (carry_ref[0], carry_ref[1], carry_ref[2], carry_ref[3])
    h1, c1, h2, c2 = lax.fori_loop(0, Tc, step, carry0, unroll=unroll)
    carry_ref[0] = h1
    carry_ref[1] = c1
    carry_ref[2] = h2
    carry_ref[3] = c2

    # ---- fc + sigmoid on the final step, written lane-dense. ----------------
    @pl.when(t_chunk == pl.num_programs(1) - 1)
    def _():
        # (8,H) x (Bt,H)^T -> (8,Bt); all 8 rows identical, take row 0.
        logits = lax.dot_general(w_fc_ref[...], h2, (((1,), (1,)), ((), ())),
                                 preferred_element_type=jnp.float32)
        out = jax.nn.sigmoid(logits[0:1, :] + b_fc_ref[...])
        out_ref[...] = out.reshape(1, 1, Bt).astype(out_ref.dtype)


# --------------------------------------------------------------------------- #
# Hardware-aware knobs (safe fallbacks if the query is unavailable)
# --------------------------------------------------------------------------- #
def _tpu_info():
    try:
        return pltpu.get_tpu_info()
    except Exception:
        return None


def _num_tensorcores():
    info = _tpu_info()
    if info is not None:
        for attr in ("num_cores", "core_count", "num_tensorcores"):
            n = getattr(info, attr, None)
            if n:
                return int(n)
    try:
        kind = jax.devices()[0].device_kind.lower()
    except Exception:
        return 1
    # 2 TensorCores per device: v7x and the megacore chips (v4 / v5p).
    return 2 if any(s in kind for s in ("v7", "v4", "v5p")) else 1


def _vmem_limit_bytes():
    info = _tpu_info()
    cap = getattr(info, "vmem_capacity_bytes", None) if info is not None else None
    if not cap:
        cap = 64 * 1024 * 1024          # conservative: v7x physical VMEM
    return int(min(cap * 3 // 4, 100 * 1024 * 1024))


# --------------------------------------------------------------------------- #
# Wrapper
# --------------------------------------------------------------------------- #
def lstm_model_forward(x, params, *, b_tile=128, t_chunk=64, interpret=False):
    """x: (B, T, 15) float32, batch_first like the PyTorch module. Returns (B, 1)."""
    B, T, Fin = x.shape
    assert Fin == F

    # Batch tile: multiple of 8, capped at b_tile; when the chip has 2
    # TensorCores, split so the "parallel" grid axis has >= 2 points (dual-TC
    # on v7x / megacore). Single-core chips keep the full tile.
    n_tc = _num_tensorcores()
    bt = min(b_tile, _round_up(B, 8))
    if n_tc > 1 and B >= 2 * 8:
        bt = min(bt, _round_up(-(-B // n_tc), 8))
    B_pad = _round_up(B, bt)
    nb = B_pad // bt

    # Time chunk: largest divisor of T (time padding would corrupt the
    # recurrence). Awkward prime long T degrades toward per-step hoisting but
    # stays correct.
    tc = min(T, t_chunk)
    while T % tc:
        tc -= 1
    nt = T // tc

    # Pad batch + the 15-wide feature dim (to 16) and go time-major so the
    # hoisted matmul reads contiguous (Tc*Bt, F) row blocks.
    x_p = jnp.pad(x, ((0, B_pad - B), (0, 0), (0, F_PAD - F)))
    x_tbf = jnp.transpose(x_p, (1, 0, 2))                     # (T, B_pad, F_PAD)

    def full(shape):
        return pl.BlockSpec(shape, lambda b, t: (0,) * len(shape))

    in_specs = [
        pl.BlockSpec((tc, bt, F_PAD), lambda b, t: (t, b, 0)),   # x time-chunk
        full((F_PAD, G)),   # w_ih1 (bf16)
        full((H, G)),       # w_hh1 (bf16)
        full((1, G)),       # b1
        full((2 * H, G)),   # w2 = [w_ih2; w_hh2] (bf16)
        full((1, G)),       # b2
        full((8, H)),       # w_fc (sublane-replicated)
        full((1, 1)),       # b_fc
    ]
    out_specs = pl.BlockSpec((1, 1, bt), lambda b, t: (b, 0, 0))

    out = pl.pallas_call(
        _lstm_kernel,
        out_shape=jax.ShapeDtypeStruct((nb, 1, bt), jnp.float32),
        grid=(nb, nt),
        in_specs=in_specs,
        out_specs=out_specs,
        scratch_shapes=[
            pltpu.VMEM((tc, bt, G), jnp.bfloat16),   # layer-1 gate slab (per chunk)
            pltpu.VMEM((4, bt, H), jnp.float32),     # h1, c1, h2, c2 carries
        ],
        compiler_params=pltpu.CompilerParams(
            dimension_semantics=("parallel", "arbitrary"),
            vmem_limit_bytes=_vmem_limit_bytes(),
        ),
        interpret=interpret,
    )(x_tbf,
      params["w_ih1"], params["w_hh1"], params["b1"],
      params["w2"], params["b2"], params["w_fc"], params["b_fc"])

    return out.reshape(B_pad)[:B].reshape(B, 1)


# --------------------------------------------------------------------------- #
# Parameters (PyTorch layout) + kernel-layout packing + pure-JAX reference
# --------------------------------------------------------------------------- #
def init_params(key):
    """PyTorch-style U(-1/sqrt(H), 1/sqrt(H)) init, PyTorch weight layout."""
    k = 1.0 / jnp.sqrt(jnp.float32(H))
    keys = jax.random.split(key, 10)

    def u(kk, shape):
        return jax.random.uniform(kk, shape, jnp.float32, -k, k)

    return {
        "w_ih1": u(keys[0], (4 * H, F)),
        "w_hh1": u(keys[1], (4 * H, H)),
        "b_ih1": u(keys[2], (4 * H,)),
        "b_hh1": u(keys[3], (4 * H,)),
        "w_ih2": u(keys[4], (4 * H, H)),
        "w_hh2": u(keys[5], (4 * H, H)),
        "b_ih2": u(keys[6], (4 * H,)),
        "b_hh2": u(keys[7], (4 * H,)),
        "w_fc":  u(keys[8], (1, H)),
        "b_fc":  u(keys[9], (1,)),
    }


def pack_params(p):
    """Kernel layout: transposed (in, 4H) weights, bf16 matmul operands,
    zero-padded F->16, stacked layer-2 weight, summed biases."""
    w_ih1 = jnp.pad(p["w_ih1"].T, ((0, F_PAD - F), (0, 0)))          # (16, 4H)
    w2 = jnp.concatenate([p["w_ih2"].T, p["w_hh2"].T], axis=0)       # (2H, 4H)
    return {
        "w_ih1": w_ih1.astype(jnp.bfloat16),
        "w_hh1": p["w_hh1"].T.astype(jnp.bfloat16),                  # (H, 4H)
        "b1":   (p["b_ih1"] + p["b_hh1"])[None, :],                  # (1, 4H)
        "w2":   w2.astype(jnp.bfloat16),                             # (2H, 4H)
        "b2":   (p["b_ih2"] + p["b_hh2"])[None, :],                  # (1, 4H)
        "w_fc": jnp.tile(p["w_fc"], (8, 1)),                         # (8, H)
        "b_fc": p["b_fc"][None, :],                                  # (1, 1)
    }


def reference_forward(x, p):
    """Pure-JAX f32 reference mirroring torch.nn.LSTM semantics."""
    B, T, _ = x.shape

    def cell(xt, h, c, w_ih, w_hh, b):
        g = xt @ w_ih.T + h @ w_hh.T + b
        i = jax.nn.sigmoid(g[:, 0 * H:1 * H])
        f = jax.nn.sigmoid(g[:, 1 * H:2 * H])
        gg = jnp.tanh(g[:, 2 * H:3 * H])
        o = jax.nn.sigmoid(g[:, 3 * H:4 * H])
        c = f * c + i * gg
        return o * jnp.tanh(c), c

    b1 = p["b_ih1"] + p["b_hh1"]
    b2 = p["b_ih2"] + p["b_hh2"]
    h1 = c1 = h2 = c2 = jnp.zeros((B, H), jnp.float32)
    for t in range(T):
        h1, c1 = cell(x[:, t, :], h1, c1, p["w_ih1"], p["w_hh1"], b1)
        h2, c2 = cell(h1, h2, c2, p["w_ih2"], p["w_hh2"], b2)
    return jax.nn.sigmoid(h2 @ p["w_fc"].T + p["b_fc"])


if __name__ == "__main__":
    key = jax.random.PRNGKey(0)
    k_param, k_x = jax.random.split(key)

    B, T = 2, 8
    x = jax.random.normal(k_x, (B, T, F), jnp.float32)
    raw = init_params(k_param)
    params = pack_params(raw)

    out = jax.block_until_ready(lstm_model_forward(x, params))
    ref = reference_forward(x, raw)

    assert out.shape == (B, 1)
    # bf16 MXU operands / bf16 gate slab -> loosened tolerance vs f32 reference.
    assert jnp.allclose(out, ref, atol=2e-2, rtol=2e-2), (out, ref)

    print("KERNEL_OK")
</pallas_src>

<mosaic_0001>
module attributes {stable_mosaic.version = 11 : i64} {
  func.func @_lstm_kernel(%arg0: i32, %arg1: i32, %arg2: memref<8x8x16xf32, #tpu.memory_space<vmem>>, %arg3: memref<16x256xbf16, #tpu.memory_space<vmem>>, %arg4: memref<64x256xbf16, #tpu.memory_space<vmem>>, %arg5: memref<1x256xf32, #tpu.memory_space<vmem>>, %arg6: memref<128x256xbf16, #tpu.memory_space<vmem>>, %arg7: memref<1x256xf32, #tpu.memory_space<vmem>>, %arg8: memref<8x64xf32, #tpu.memory_space<vmem>>, %arg9: memref<1x1xf32, #tpu.memory_space<vmem>>, %arg10: memref<1x1x8xf32, #tpu.memory_space<vmem>>, %arg11: memref<8x8x256xbf16, #tpu.memory_space<vmem>>, %arg12: memref<4x8x64xf32, #tpu.memory_space<vmem>>) attributes {dimension_semantics = [#tpu.dimension_semantics<parallel>, #tpu.dimension_semantics<arbitrary>], iteration_bounds = array<i64: 1, 1>, scalar_prefetch = 0 : i64, scratch_operands = 2 : i64, tpu.core_type = #tpu.core_type<tc>, window_params = [{transform_indices = @transform_0, window_bounds = array<i64: 8, 8, 16>}, {pipeline_mode = #tpu.pipeline_mode<synchronous>, transform_indices = @transform_1, window_bounds = array<i64: 16, 256>}, {pipeline_mode = #tpu.pipeline_mode<synchronous>, transform_indices = @transform_2, window_bounds = array<i64: 64, 256>}, {pipeline_mode = #tpu.pipeline_mode<synchronous>, transform_indices = @transform_3, window_bounds = array<i64: 1, 256>}, {pipeline_mode = #tpu.pipeline_mode<synchronous>, transform_indices = @transform_4, window_bounds = array<i64: 128, 256>}, {pipeline_mode = #tpu.pipeline_mode<synchronous>, transform_indices = @transform_5, window_bounds = array<i64: 1, 256>}, {pipeline_mode = #tpu.pipeline_mode<synchronous>, transform_indices = @transform_6, window_bounds = array<i64: 8, 64>}, {pipeline_mode = #tpu.pipeline_mode<synchronous>, transform_indices = @transform_7, window_bounds = array<i64: 1, 1>}, {transform_indices = @transform_8, window_bounds = array<i64: 1, 1, 8>}]} {
    %c0_i32 = arith.constant 0 : i32
    %0 = arith.cmpi eq, %arg1, %c0_i32 : i32
    %1 = arith.extui %0 : i1 to i32
    %c0_i32_0 = arith.constant 0 : i32
    %2 = arith.cmpi ne, %1, %c0_i32_0 : i32
    scf.if %2 {
      %cst_104 = arith.constant 0.000000e+00 : f32
      %466 = vector.broadcast %cst_104 : f32 to vector<4x8x64xf32>
      %c0_105 = arith.constant 0 : index
      %c0_106 = arith.constant 0 : index
      %c0_107 = arith.constant 0 : index
      %467 = vector.load %arg12[%c0_105, %c0_106, %c0_107] : memref<4x8x64xf32, #tpu.memory_space<vmem>>, vector<4x8x64xf32>
      tpu.vector_store %arg12[%c0_105, %c0_106, %c0_107], %466 {strides = array<i32>} : memref<4x8x64xf32, #tpu.memory_space<vmem>>, vector<4x8x64xf32>,
    } else {
    }
    %c0 = arith.constant 0 : index
    %c0_1 = arith.constant 0 : index
    %3 = vector.load %arg4[%c0, %c0_1] : memref<64x256xbf16, #tpu.memory_space<vmem>>, vector<64x256xbf16>
    %c0_2 = arith.constant 0 : index
    %c0_3 = arith.constant 0 : index
    %4 = vector.load %arg6[%c0_2, %c0_3] : memref<128x256xbf16, #tpu.memory_space<vmem>>, vector<128x256xbf16>
    %c0_4 = arith.constant 0 : index
    %c0_5 = arith.constant 0 : index
    %5 = vector.load %arg7[%c0_4, %c0_5] : memref<1x256xf32, #tpu.memory_space<vmem>>, vector<1x256xf32>
    %6 = vector.shape_cast %5 : vector<1x256xf32> to vector<1x256xf32>
    %7 = vector.broadcast %6 : vector<1x256xf32> to vector<8x256xf32>
    %c0_6 = arith.constant 0 : index
    %c0_7 = arith.constant 0 : index
    %c0_8 = arith.constant 0 : index
    %8 = vector.load %arg2[%c0_6, %c0_7, %c0_8] : memref<8x8x16xf32, #tpu.memory_space<vmem>>, vector<8x8x16xf32>
    %9 = vector.shape_cast %8 : vector<8x8x16xf32> to vector<64x16xf32>
    %10 = arith.truncf %9 : vector<64x16xf32> to vector<64x16xbf16>
    %c0_9 = arith.constant 0 : index
    %c0_10 = arith.constant 0 : index
    %11 = vector.load %arg3[%c0_9, %c0_10] : memref<16x256xbf16, #tpu.memory_space<vmem>>, vector<16x256xbf16>
    %cst = arith.constant dense<0.000000e+00> : vector<64x256xf32>
    %12 = tpu.matmul %10, %11, %cst {dimension_numbers = #tpu.dot_dimension_numbers<[1], [0], [0], [1], [0, 0, 1, 1], [], []>} : vector<64x16xbf16>, vector<16x256xbf16>, vector<64x256xf32> -> vector<64x256xf32>
    %c0_11 = arith.constant 0 : index
    %c0_12 = arith.constant 0 : index
    %13 = vector.load %arg5[%c0_11, %c0_12] : memref<1x256xf32, #tpu.memory_space<vmem>>, vector<1x256xf32>
    %14 = vector.broadcast %13 : vector<1x256xf32> to vector<64x256xf32>
    %15 = arith.addf %12, %14 : vector<64x256xf32>
    %16 = vector.shape_cast %15 : vector<64x256xf32> to vector<8x8x256xf32>
    %17 = arith.truncf %16 : vector<8x8x256xf32> to vector<8x8x256xbf16>
    %c0_13 = arith.constant 0 : index
    %c0_14 = arith.constant 0 : index
    %c0_15 = arith.constant 0 : index
    %18 = vector.load %arg11[%c0_13, %c0_14, %c0_15] : memref<8x8x256xbf16, #tpu.memory_space<vmem>>, vector<8x8x256xbf16>
    tpu.vector_store %arg11[%c0_13, %c0_14, %c0_15], %17 {strides = array<i32>} : memref<8x8x256xbf16, #tpu.memory_space<vmem>>, vector<8x8x256xbf16>,
    %c0_16 = arith.constant 0 : index
    %c0_17 = arith.constant 0 : index
    %c0_18 = arith.constant 0 : index
    %19 = vector.load %arg12[%c0_16, %c0_17, %c0_18] : memref<4x8x64xf32, #tpu.memory_space<vmem>>, vector<1x8x64xf32>
    %20 = vector.shape_cast %19 : vector<1x8x64xf32> to vector<8x64xf32>
    %c1 = arith.constant 1 : index
    %c0_19 = arith.constant 0 : index
    %c0_20 = arith.constant 0 : index
    %21 = vector.load %arg12[%c1, %c0_19, %c0_20] : memref<4x8x64xf32, #tpu.memory_space<vmem>>, vector<1x8x64xf32>
    %22 = vector.shape_cast %21 : vector<1x8x64xf32> to vector<8x64xf32>
    %c2 = arith.constant 2 : index
    %c0_21 = arith.constant 0 : index
    %c0_22 = arith.constant 0 : index
    %23 = vector.load %arg12[%c2, %c0_21, %c0_22] : memref<4x8x64xf32, #tpu.memory_space<vmem>>, vector<1x8x64xf32>
    %24 = vector.shape_cast %23 : vector<1x8x64xf32> to vector<8x64xf32>
    %c3 = arith.constant 3 : index
    %c0_23 = arith.constant 0 : index
    %c0_24 = arith.constant 0 : index
    %25 = vector.load %arg12[%c3, %c0_23, %c0_24] : memref<4x8x64xf32, #tpu.memory_space<vmem>>, vector<1x8x64xf32>
    %26 = vector.shape_cast %25 : vector<1x8x64xf32> to vector<8x64xf32>
    %c0_i32_25 = arith.constant 0 : i32
    %27 = arith.index_cast %c0_i32_25 : i32 to index
    %c0_26 = arith.constant 0 : index
    %c0_27 = arith.constant 0 : index
    %28 = vector.load %arg11[%27, %c0_26, %c0_27] : memref<8x8x256xbf16, #tpu.memory_space<vmem>>, vector<1x8x256xbf16>
    %29 = vector.shape_cast %28 : vector<1x8x256xbf16> to vector<8x256xbf16>
    %30 = arith.extf %29 : vector<8x256xbf16> to vector<8x256xf32>
    %31 = arith.truncf %20 : vector<8x64xf32> to vector<8x64xbf16>
    %cst_28 = arith.constant dense<0.000000e+00> : vector<8x256xf32>
    %32 = tpu.matmul %31, %3, %cst_28 {dimension_numbers = #tpu.dot_dimension_numbers<[1], [0], [0], [1], [0, 0, 1, 1], [], []>} : vector<8x64xbf16>, vector<64x256xbf16>, vector<8x256xf32> -> vector<8x256xf32>
    %33 = arith.addf %30, %32 : vector<8x256xf32>
    %34 = vector.extract_strided_slice %33 {offsets = [0, 0], sizes = [8, 128], strides = [1, 1]} : vector<8x256xf32> to vector<8x128xf32>
    %35 = arith.negf %34 : vector<8x128xf32>
    %36 = math.exp %35 : vector<8x128xf32>
    %cst_29 = arith.constant 1.000000e+00 : f32
    %37 = vector.broadcast %cst_29 : f32 to vector<8x128xf32>
    %38 = arith.addf %37, %36 : vector<8x128xf32>
    %39 = arith.divf %37, %38 : vector<8x128xf32>
    %40 = vector.extract_strided_slice %39 {offsets = [0, 0], sizes = [8, 64], strides = [1, 1]} : vector<8x128xf32> to vector<8x64xf32>
    %41 = vector.extract_strided_slice %39 {offsets = [0, 64], sizes = [8, 64], strides = [1, 1]} : vector<8x128xf32> to vector<8x64xf32>
    %42 = vector.extract_strided_slice %33 {offsets = [0, 128], sizes = [8, 64], strides = [1, 1]} : vector<8x256xf32> to vector<8x64xf32>
    %43 = math.tanh %42 : vector<8x64xf32>
    %44 = vector.extract_strided_slice %33 {offsets = [0, 192], sizes = [8, 64], strides = [1, 1]} : vector<8x256xf32> to vector<8x64xf32>
    %45 = arith.negf %44 : vector<8x64xf32>
    %46 = math.exp %45 : vector<8x64xf32>
    %cst_30 = arith.constant 1.000000e+00 : f32
    %47 = vector.broadcast %cst_30 : f32 to vector<8x64xf32>
    %48 = arith.addf %47, %46 : vector<8x64xf32>
    %49 = arith.divf %47, %48 : vector<8x64xf32>
    %50 = arith.mulf %41, %22 : vector<8x64xf32>
    %51 = arith.mulf %40, %43 : vector<8x64xf32>
    %52 = arith.addf %50, %51 : vector<8x64xf32>
    %53 = math.tanh %52 : vector<8x64xf32>
    %54 = arith.mulf %49, %53 : vector<8x64xf32>
    %55 = tpu.concatenate %54, %24 in 1 : vector<8x64xf32>, vector<8x64xf32> -> vector<8x128xf32>
    %56 = arith.truncf %55 : vector<8x128xf32> to vector<8x128xbf16>
    %cst_31 = arith.constant dense<0.000000e+00> : vector<8x256xf32>
    %57 = tpu.matmul %56, %4, %cst_31 {dimension_numbers = #tpu.dot_dimension_numbers<[1], [0], [0], [1], [0, 0, 1, 1], [], []>} : vector<8x128xbf16>, vector<128x256xbf16>, vector<8x256xf32> -> vector<8x256xf32>
    %58 = arith.addf %57, %7 : vector<8x256xf32>
    %59 = vector.extract_strided_slice %58 {offsets = [0, 0], sizes = [8, 128], strides = [1, 1]} : vector<8x256xf32> to vector<8x128xf32>
    %60 = arith.negf %59 : vector<8x128xf32>
    %61 = math.exp %60 : vector<8x128xf32>
    %cst_32 = arith.constant 1.000000e+00 : f32
    %62 = vector.broadcast %cst_32 : f32 to vector<8x128xf32>
    %63 = arith.addf %62, %61 : vector<8x128xf32>
    %64 = arith.divf %62, %63 : vector<8x128xf32>
    %65 = vector.extract_strided_slice %64 {offsets = [0, 0], sizes = [8, 64], strides = [1, 1]} : vector<8x128xf32> to vector<8x64xf32>
    %66 = vector.extract_strided_slice %64 {offsets = [0, 64], sizes = [8, 64], strides = [1, 1]} : vector<8x128xf32> to vector<8x64xf32>
    %67 = vector.extract_strided_slice %58 {offsets = [0, 128], sizes = [8, 64], strides = [1, 1]} : vector<8x256xf32> to vector<8x64xf32>
    %68 = math.tanh %67 : vector<8x64xf32>
    %69 = vector.extract_strided_slice %58 {offsets = [0, 192], sizes = [8, 64], strides = [1, 1]} : vector<8x256xf32> to vector<8x64xf32>
    %70 = arith.negf %69 : vector<8x64xf32>
    %71 = math.exp %70 : vector<8x64xf32>
    %cst_33 = arith.constant 1.000000e+00 : f32
    %72 = vector.broadcast %cst_33 : f32 to vector<8x64xf32>
    %73 = arith.addf %72, %71 : vector<8x64xf32>
    %74 = arith.divf %72, %73 : vector<8x64xf32>
    %75 = arith.mulf %66, %26 : vector<8x64xf32>
    %76 = arith.mulf %65, %68 : vector<8x64xf32>
    %77 = arith.addf %75, %76 : vector<8x64xf32>
    %78 = math.tanh %77 : vector<8x64xf32>
    %79 = arith.mulf %74, %78 : vector<8x64xf32>
    %c1_i32 = arith.constant 1 : i32
    %80 = arith.index_cast %c1_i32 : i32 to index
    %c0_34 = arith.constant 0 : index
    %c0_35 = arith.constant 0 : index
    %81 = vector.load %arg11[%80, %c0_34, %c0_35] : memref<8x8x256xbf16, #tpu.memory_space<vmem>>, vector<1x8x256xbf16>
    %82 = vector.shape_cast %81 : vector<1x8x256xbf16> to vector<8x256xbf16>
    %83 = arith.extf %82 : vector<8x256xbf16> to vector<8x256xf32>
    %84 = arith.truncf %54 : vector<8x64xf32> to vector<8x64xbf16>
    %cst_36 = arith.constant dense<0.000000e+00> : vector<8x256xf32>
    %85 = tpu.matmul %84, %3, %cst_36 {dimension_numbers = #tpu.dot_dimension_numbers<[1], [0], [0], [1], [0, 0, 1, 1], [], []>} : vector<8x64xbf16>, vector<64x256xbf16>, vector<8x256xf32> -> vector<8x256xf32>
    %86 = arith.addf %83, %85 : vector<8x256xf32>
    %87 = vector.extract_strided_slice %86 {offsets = [0, 0], sizes = [8, 128], strides = [1, 1]} : vector<8x256xf32> to vector<8x128xf32>
    %88 = arith.negf %87 : vector<8x128xf32>
    %89 = math.exp %88 : vector<8x128xf32>
    %cst_37 = arith.constant 1.000000e+00 : f32
    %90 = vector.broadcast %cst_37 : f32 to vector<8x128xf32>
    %91 = arith.addf %90, %89 : vector<8x128xf32>
    %92 = arith.divf %90, %91 : vector<8x128xf32>
    %93 = vector.extract_strided_slice %92 {offsets = [0, 0], sizes = [8, 64], strides = [1, 1]} : vector<8x128xf32> to vector<8x64xf32>
    %94 = vector.extract_strided_slice %92 {offsets = [0, 64], sizes = [8, 64], strides = [1, 1]} : vector<8x128xf32> to vector<8x64xf32>
    %95 = vector.extract_strided_slice %86 {offsets = [0, 128], sizes = [8, 64], strides = [1, 1]} : vector<8x256xf32> to vector<8x64xf32>
    %96 = math.tanh %95 : vector<8x64xf32>
    %97 = vector.extract_strided_slice %86 {offsets = [0, 192], sizes = [8, 64], strides = [1, 1]} : vector<8x256xf32> to vector<8x64xf32>
    %98 = arith.negf %97 : vector<8x64xf32>
    %99 = math.exp %98 : vector<8x64xf32>
    %cst_38 = arith.constant 1.000000e+00 : f32
    %100 = vector.broadcast %cst_38 : f32 to vector<8x64xf32>
    %101 = arith.addf %100, %99 : vector<8x64xf32>
    %102 = arith.divf %100, %101 : vector<8x64xf32>
    %103 = arith.mulf %94, %52 : vector<8x64xf32>
    %104 = arith.mulf %93, %96 : vector<8x64xf32>
    %105 = arith.addf %103, %104 : vector<8x64xf32>
    %106 = math.tanh %105 : vector<8x64xf32>
    %107 = arith.mulf %102, %106 : vector<8x64xf32>
    %108 = tpu.concatenate %107, %79 in 1 : vector<8x64xf32>, vector<8x64xf32> -> vector<8x128xf32>
    %109 = arith.truncf %108 : vector<8x128xf32> to vector<8x128xbf16>
    %cst_39 = arith.constant dense<0.000000e+00> : vector<8x256xf32>
    %110 = tpu.matmul %109, %4, %cst_39 {dimension_numbers = #tpu.dot_dimension_numbers<[1], [0], [0], [1], [0, 0, 1, 1], [], []>} : vector<8x128xbf16>, vector<128x256xbf16>, vector<8x256xf32> -> vector<8x256xf32>
    %111 = arith.addf %110, %7 : vector<8x256xf32>
    %112 = vector.extract_strided_slice %111 {offsets = [0, 0], sizes = [8, 128], strides = [1, 1]} : vector<8x256xf32> to vector<8x128xf32>
    %113 = arith.negf %112 : vector<8x128xf32>
    %114 = math.exp %113 : vector<8x128xf32>
    %cst_40 = arith.constant 1.000000e+00 : f32
    %115 = vector.broadcast %cst_40 : f32 to vector<8x128xf32>
    %116 = arith.addf %115, %114 : vector<8x128xf32>
    %117 = arith.divf %115, %116 : vector<8x128xf32>
    %118 = vector.extract_strided_slice %117 {offsets = [0, 0], sizes = [8, 64], strides = [1, 1]} : vector<8x128xf32> to vector<8x64xf32>
    %119 = vector.extract_strided_slice %117 {offsets = [0, 64], sizes = [8, 64], strides = [1, 1]} : vector<8x128xf32> to vector<8x64xf32>
    %120 = vector.extract_strided_slice %111 {offsets = [0, 128], sizes = [8, 64], strides = [1, 1]} : vector<8x256xf32> to vector<8x64xf32>
    %121 = math.tanh %120 : vector<8x64xf32>
    %122 = vector.extract_strided_slice %111 {offsets = [0, 192], sizes = [8, 64], strides = [1, 1]} : vector<8x256xf32> to vector<8x64xf32>
    %123 = arith.negf %122 : vector<8x64xf32>
    %124 = math.exp %123 : vector<8x64xf32>
    %cst_41 = arith.constant 1.000000e+00 : f32
    %125 = vector.broadcast %cst_41 : f32 to vector<8x64xf32>
    %126 = arith.addf %125, %124 : vector<8x64xf32>
    %127 = arith.divf %125, %126 : vector<8x64xf32>
    %128 = arith.mulf %119, %77 : vector<8x64xf32>
    %129 = arith.mulf %118, %121 : vector<8x64xf32>
    %130 = arith.addf %128, %129 : vector<8x64xf32>
    %131 = math.tanh %130 : vector<8x64xf32>
    %132 = arith.mulf %127, %131 : vector<8x64xf32>
    %c2_i32 = arith.constant 2 : i32
    %133 = arith.index_cast %c2_i32 : i32 to index
    %c0_42 = arith.constant 0 : index
    %c0_43 = arith.constant 0 : index
    %134 = vector.load %arg11[%133, %c0_42, %c0_43] : memref<8x8x256xbf16, #tpu.memory_space<vmem>>, vector<1x8x256xbf16>
    %135 = vector.shape_cast %134 : vector<1x8x256xbf16> to vector<8x256xbf16>
    %136 = arith.extf %135 : vector<8x256xbf16> to vector<8x256xf32>
    %137 = arith.truncf %107 : vector<8x64xf32> to vector<8x64xbf16>
    %cst_44 = arith.constant dense<0.000000e+00> : vector<8x256xf32>
    %138 = tpu.matmul %137, %3, %cst_44 {dimension_numbers = #tpu.dot_dimension_numbers<[1], [0], [0], [1], [0, 0, 1, 1], [], []>} : vector<8x64xbf16>, vector<64x256xbf16>, vector<8x256xf32> -> vector<8x256xf32>
    %139 = arith.addf %136, %138 : vector<8x256xf32>
    %140 = vector.extract_strided_slice %139 {offsets = [0, 0], sizes = [8, 128], strides = [1, 1]} : vector<8x256xf32> to vector<8x128xf32>
    %141 = arith.negf %140 : vector<8x128xf32>
    %142 = math.exp %141 : vector<8x128xf32>
    %cst_45 = arith.constant 1.000000e+00 : f32
    %143 = vector.broadcast %cst_45 : f32 to vector<8x128xf32>
    %144 = arith.addf %143, %142 : vector<8x128xf32>
    %145 = arith.divf %143, %144 : vector<8x128xf32>
    %146 = vector.extract_strided_slice %145 {offsets = [0, 0], sizes = [8, 64], strides = [1, 1]} : vector<8x128xf32> to vector<8x64xf32>
    %147 = vector.extract_strided_slice %145 {offsets = [0, 64], sizes = [8, 64], strides = [1, 1]} : vector<8x128xf32> to vector<8x64xf32>
    %148 = vector.extract_strided_slice %139 {offsets = [0, 128], sizes = [8, 64], strides = [1, 1]} : vector<8x256xf32> to vector<8x64xf32>
    %149 = math.tanh %148 : vector<8x64xf32>
    %150 = vector.extract_strided_slice %139 {offsets = [0, 192], sizes = [8, 64], strides = [1, 1]} : vector<8x256xf32> to vector<8x64xf32>
    %151 = arith.negf %150 : vector<8x64xf32>
    %152 = math.exp %151 : vector<8x64xf32>
    %cst_46 = arith.constant 1.000000e+00 : f32
    %153 = vector.broadcast %cst_46 : f32 to vector<8x64xf32>
    %154 = arith.addf %153, %152 : vector<8x64xf32>
    %155 = arith.divf %153, %154 : vector<8x64xf32>
    %156 = arith.mulf %147, %105 : vector<8x64xf32>
    %157 = arith.mulf %146, %149 : vector<8x64xf32>
    %158 = arith.addf %156, %157 : vector<8x64xf32>
    %159 = math.tanh %158 : vector<8x64xf32>
    %160 = arith.mulf %155, %159 : vector<8x64xf32>
    %161 = tpu.concatenate %160, %132 in 1 : vector<8x64xf32>, vector<8x64xf32> -> vector<8x128xf32>
    %162 = arith.truncf %161 : vector<8x128xf32> to vector<8x128xbf16>
    %cst_47 = arith.constant dense<0.000000e+00> : vector<8x256xf32>
    %163 = tpu.matmul %162, %4, %cst_47 {dimension_numbers = #tpu.dot_dimension_numbers<[1], [0], [0], [1], [0, 0, 1, 1], [], []>} : vector<8x128xbf16>, vector<128x256xbf16>, vector<8x256xf32> -> vector<8x256xf32>
    %164 = arith.addf %163, %7 : vector<8x256xf32>
    %165 = vector.extract_strided_slice %164 {offsets = [0, 0], sizes = [8, 128], strides = [1, 1]} : vector<8x256xf32> to vector<8x128xf32>
    %166 = arith.negf %165 : vector<8x128xf32>
    %167 = math.exp %166 : vector<8x128xf32>
    %cst_48 = arith.constant 1.000000e+00 : f32
    %168 = vector.broadcast %cst_48 : f32 to vector<8x128xf32>
    %169 = arith.addf %168, %167 : vector<8x128xf32>
    %170 = arith.divf %168, %169 : vector<8x128xf32>
    %171 = vector.extract_strided_slice %170 {offsets = [0, 0], sizes = [8, 64], strides = [1, 1]} : vector<8x128xf32> to vector<8x64xf32>
    %172 = vector.extract_strided_slice %170 {offsets = [0, 64], sizes = [8, 64], strides = [1, 1]} : vector<8x128xf32> to vector<8x64xf32>
    %173 = vector.extract_strided_slice %164 {offsets = [0, 128], sizes = [8, 64], strides = [1, 1]} : vector<8x256xf32> to vector<8x64xf32>
    %174 = math.tanh %173 : vector<8x64xf32>
    %175 = vector.extract_strided_slice %164 {offsets = [0, 192], sizes = [8, 64], strides = [1, 1]} : vector<8x256xf32> to vector<8x64xf32>
    %176 = arith.negf %175 : vector<8x64xf32>
    %177 = math.exp %176 : vector<8x64xf32>
    %cst_49 = arith.constant 1.000000e+00 : f32
    %178 = vector.broadcast %cst_49 : f32 to vector<8x64xf32>
    %179 = arith.addf %178, %177 : vector<8x64xf32>
    %180 = arith.divf %178, %179 : vector<8x64xf32>
    %181 = arith.mulf %172, %130 : vector<8x64xf32>
    %182 = arith.mulf %171, %174 : vector<8x64xf32>
    %183 = arith.addf %181, %182 : vector<8x64xf32>
    %184 = math.tanh %183 : vector<8x64xf32>
    %185 = arith.mulf %180, %184 : vector<8x64xf32>
    %c3_i32 = arith.constant 3 : i32
    %186 = arith.index_cast %c3_i32 : i32 to index
    %c0_50 = arith.constant 0 : index
    %c0_51 = arith.constant 0 : index
    %187 = vector.load %arg11[%186, %c0_50, %c0_51] : memref<8x8x256xbf16, #tpu.memory_space<vmem>>, vector<1x8x256xbf16>
    %188 = vector.shape_cast %187 : vector<1x8x256xbf16> to vector<8x256xbf16>
    %189 = arith.extf %188 : vector<8x256xbf16> to vector<8x256xf32>
    %190 = arith.truncf %160 : vector<8x64xf32> to vector<8x64xbf16>
    %cst_52 = arith.constant dense<0.000000e+00> : vector<8x256xf32>
    %191 = tpu.matmul %190, %3, %cst_52 {dimension_numbers = #tpu.dot_dimension_numbers<[1], [0], [0], [1], [0, 0, 1, 1], [], []>} : vector<8x64xbf16>, vector<64x256xbf16>, vector<8x256xf32> -> vector<8x256xf32>
    %192 = arith.addf %189, %191 : vector<8x256xf32>
    %193 = vector.extract_strided_slice %192 {offsets = [0, 0], sizes = [8, 128], strides = [1, 1]} : vector<8x256xf32> to vector<8x128xf32>
    %194 = arith.negf %193 : vector<8x128xf32>
    %195 = math.exp %194 : vector<8x128xf32>
    %cst_53 = arith.constant 1.000000e+00 : f32
    %196 = vector.broadcast %cst_53 : f32 to vector<8x128xf32>
    %197 = arith.addf %196, %195 : vector<8x128xf32>
    %198 = arith.divf %196, %197 : vector<8x128xf32>
    %199 = vector.extract_strided_slice %198 {offsets = [0, 0], sizes = [8, 64], strides = [1, 1]} : vector<8x128xf32> to vector<8x64xf32>
    %200 = vector.extract_strided_slice %198 {offsets = [0, 64], sizes = [8, 64], strides = [1, 1]} : vector<8x128xf32> to vector<8x64xf32>
    %201 = vector.extract_strided_slice %192 {offsets = [0, 128], sizes = [8, 64], strides = [1, 1]} : vector<8x256xf32> to vector<8x64xf32>
    %202 = math.tanh %201 : vector<8x64xf32>
    %203 = vector.extract_strided_slice %192 {offsets = [0, 192], sizes = [8, 64], strides = [1, 1]} : vector<8x256xf32> to vector<8x64xf32>
    %204 = arith.negf %203 : vector<8x64xf32>
    %205 = math.exp %204 : vector<8x64xf32>
    %cst_54 = arith.constant 1.000000e+00 : f32
    %206 = vector.broadcast %cst_54 : f32 to vector<8x64xf32>
    %207 = arith.addf %206, %205 : vector<8x64xf32>
    %208 = arith.divf %206, %207 : vector<8x64xf32>
    %209 = arith.mulf %200, %158 : vector<8x64xf32>
    %210 = arith.mulf %199, %202 : vector<8x64xf32>
    %211 = arith.addf %209, %210 : vector<8x64xf32>
    %212 = math.tanh %211 : vector<8x64xf32>
    %213 = arith.mulf %208, %212 : vector<8x64xf32>
    %214 = tpu.concatenate %213, %185 in 1 : vector<8x64xf32>, vector<8x64xf32> -> vector<8x128xf32>
    %215 = arith.truncf %214 : vector<8x128xf32> to vector<8x128xbf16>
    %cst_55 = arith.constant dense<0.000000e+00> : vector<8x256xf32>
    %216 = tpu.matmul %215, %4, %cst_55 {dimension_numbers = #tpu.dot_dimension_numbers<[1], [0], [0], [1], [0, 0, 1, 1], [], []>} : vector<8x128xbf16>, vector<128x256xbf16>, vector<8x256xf32> -> vector<8x256xf32>
    %217 = arith.addf %216, %7 : vector<8x256xf32>
    %218 = vector.extract_strided_slice %217 {offsets = [0, 0], sizes = [8, 128], strides = [1, 1]} : vector<8x256xf32> to vector<8x128xf32>
    %219 = arith.negf %218 : vector<8x128xf32>
    %220 = math.exp %219 : vector<8x128xf32>
    %cst_56 = arith.constant 1.000000e+00 : f32
    %221 = vector.broadcast %cst_56 : f32 to vector<8x128xf32>
    %222 = arith.addf %221, %220 : vector<8x128xf32>
    %223 = arith.divf %221, %222 : vector<8x128xf32>
    %224 = vector.extract_strided_slice %223 {offsets = [0, 0], sizes = [8, 64], strides = [1, 1]} : vector<8x128xf32> to vector<8x64xf32>
    %225 = vector.extract_strided_slice %223 {offsets = [0, 64], sizes = [8, 64], strides = [1, 1]} : vector<8x128xf32> to vector<8x64xf32>
    %226 = vector.extract_strided_slice %217 {offsets = [0, 128], sizes = [8, 64], strides = [1, 1]} : vector<8x256xf32> to vector<8x64xf32>
    %227 = math.tanh %226 : vector<8x64xf32>
    %228 = vector.extract_strided_slice %217 {offsets = [0, 192], sizes = [8, 64], strides = [1, 1]} : vector<8x256xf32> to vector<8x64xf32>
    %229 = arith.negf %228 : vector<8x64xf32>
    %230 = math.exp %229 : vector<8x64xf32>
    %cst_57 = arith.constant 1.000000e+00 : f32
    %231 = vector.broadcast %cst_57 : f32 to vector<8x64xf32>
    %232 = arith.addf %231, %230 : vector<8x64xf32>
    %233 = arith.divf %231, %232 : vector<8x64xf32>
    %234 = arith.mulf %225, %183 : vector<8x64xf32>
    %235 = arith.mulf %224, %227 : vector<8x64xf32>
    %236 = arith.addf %234, %235 : vector<8x64xf32>
    %237 = math.tanh %236 : vector<8x64xf32>
    %238 = arith.mulf %233, %237 : vector<8x64xf32>
    %c4_i32 = arith.constant 4 : i32
    %239 = arith.index_cast %c4_i32 : i32 to index
    %c0_58 = arith.constant 0 : index
    %c0_59 = arith.constant 0 : index
    %240 = vector.load %arg11[%239, %c0_58, %c0_59] : memref<8x8x256xbf16, #tpu.memory_space<vmem>>, vector<1x8x256xbf16>
    %241 = vector.shape_cast %240 : vector<1x8x256xbf16> to vector<8x256xbf16>
    %242 = arith.extf %241 : vector<8x256xbf16> to vector<8x256xf32>
    %243 = arith.truncf %213 : vector<8x64xf32> to vector<8x64xbf16>
    %cst_60 = arith.constant dense<0.000000e+00> : vector<8x256xf32>
    %244 = tpu.matmul %243, %3, %cst_60 {dimension_numbers = #tpu.dot_dimension_numbers<[1], [0], [0], [1], [0, 0, 1, 1], [], []>} : vector<8x64xbf16>, vector<64x256xbf16>, vector<8x256xf32> -> vector<8x256xf32>
    %245 = arith.addf %242, %244 : vector<8x256xf32>
    %246 = vector.extract_strided_slice %245 {offsets = [0, 0], sizes = [8, 128], strides = [1, 1]} : vector<8x256xf32> to vector<8x128xf32>
    %247 = arith.negf %246 : vector<8x128xf32>
    %248 = math.exp %247 : vector<8x128xf32>
    %cst_61 = arith.constant 1.000000e+00 : f32
    %249 = vector.broadcast %cst_61 : f32 to vector<8x128xf32>
    %250 = arith.addf %249, %248 : vector<8x128xf32>
    %251 = arith.divf %249, %250 : vector<8x128xf32>
    %252 = vector.extract_strided_slice %251 {offsets = [0, 0], sizes = [8, 64], strides = [1, 1]} : vector<8x128xf32> to vector<8x64xf32>
    %253 = vector.extract_strided_slice %251 {offsets = [0, 64], sizes = [8, 64], strides = [1, 1]} : vector<8x128xf32> to vector<8x64xf32>
    %254 = vector.extract_strided_slice %245 {offsets = [0, 128], sizes = [8, 64], strides = [1, 1]} : vector<8x256xf32> to vector<8x64xf32>
    %255 = math.tanh %254 : vector<8x64xf32>
    %256 = vector.extract_strided_slice %245 {offsets = [0, 192], sizes = [8, 64], strides = [1, 1]} : vector<8x256xf32> to vector<8x64xf32>
    %257 = arith.negf %256 : vector<8x64xf32>
    %258 = math.exp %257 : vector<8x64xf32>
    %cst_62 = arith.constant 1.000000e+00 : f32
    %259 = vector.broadcast %cst_62 : f32 to vector<8x64xf32>
    %260 = arith.addf %259, %258 : vector<8x64xf32>
    %261 = arith.divf %259, %260 : vector<8x64xf32>
    %262 = arith.mulf %253, %211 : vector<8x64xf32>
    %263 = arith.mulf %252, %255 : vector<8x64xf32>
    %264 = arith.addf %262, %263 : vector<8x64xf32>
    %265 = math.tanh %264 : vector<8x64xf32>
    %266 = arith.mulf %261, %265 : vector<8x64xf32>
    %267 = tpu.concatenate %266, %238 in 1 : vector<8x64xf32>, vector<8x64xf32> -> vector<8x128xf32>
    %268 = arith.truncf %267 : vector<8x128xf32> to vector<8x128xbf16>
    %cst_63 = arith.constant dense<0.000000e+00> : vector<8x256xf32>
    %269 = tpu.matmul %268, %4, %cst_63 {dimension_numbers = #tpu.dot_dimension_numbers<[1], [0], [0], [1], [0, 0, 1, 1], [], []>} : vector<8x128xbf16>, vector<128x256xbf16>, vector<8x256xf32> -> vector<8x256xf32>
    %270 = arith.addf %269, %7 : vector<8x256xf32>
    %271 = vector.extract_strided_slice %270 {offsets = [0, 0], sizes = [8, 128], strides = [1, 1]} : vector<8x256xf32> to vector<8x128xf32>
    %272 = arith.negf %271 : vector<8x128xf32>
    %273 = math.exp %272 : vector<8x128xf32>
    %cst_64 = arith.constant 1.000000e+00 : f32
    %274 = vector.broadcast %cst_64 : f32 to vector<8x128xf32>
    %275 = arith.addf %274, %273 : vector<8x128xf32>
    %276 = arith.divf %274, %275 : vector<8x128xf32>
    %277 = vector.extract_strided_slice %276 {offsets = [0, 0], sizes = [8, 64], strides = [1, 1]} : vector<8x128xf32> to vector<8x64xf32>
    %278 = vector.extract_strided_slice %276 {offsets = [0, 64], sizes = [8, 64], strides = [1, 1]} : vector<8x128xf32> to vector<8x64xf32>
    %279 = vector.extract_strided_slice %270 {offsets = [0, 128], sizes = [8, 64], strides = [1, 1]} : vector<8x256xf32> to vector<8x64xf32>
    %280 = math.tanh %279 : vector<8x64xf32>
    %281 = vector.extract_strided_slice %270 {offsets = [0, 192], sizes = [8, 64], strides = [1, 1]} : vector<8x256xf32> to vector<8x64xf32>
    %282 = arith.negf %281 : vector<8x64xf32>
    %283 = math.exp %282 : vector<8x64xf32>
    %cst_65 = arith.constant 1.000000e+00 : f32
    %284 = vector.broadcast %cst_65 : f32 to vector<8x64xf32>
    %285 = arith.addf %284, %283 : vector<8x64xf32>
    %286 = arith.divf %284, %285 : vector<8x64xf32>
    %287 = arith.mulf %278, %236 : vector<8x64xf32>
    %288 = arith.mulf %277, %280 : vector<8x64xf32>
    %289 = arith.addf %287, %288 : vector<8x64xf32>
    %290 = math.tanh %289 : vector<8x64xf32>
    %291 = arith.mulf %286, %290 : vector<8x64xf32>
    %c5_i32 = arith.constant 5 : i32
    %292 = arith.index_cast %c5_i32 : i32 to index
    %c0_66 = arith.constant 0 : index
    %c0_67 = arith.constant 0 : index
    %293 = vector.load %arg11[%292, %c0_66, %c0_67] : memref<8x8x256xbf16, #tpu.memory_space<vmem>>, vector<1x8x256xbf16>
    %294 = vector.shape_cast %293 : vector<1x8x256xbf16> to vector<8x256xbf16>
    %295 = arith.extf %294 : vector<8x256xbf16> to vector<8x256xf32>
    %296 = arith.truncf %266 : vector<8x64xf32> to vector<8x64xbf16>
    %cst_68 = arith.constant dense<0.000000e+00> : vector<8x256xf32>
    %297 = tpu.matmul %296, %3, %cst_68 {dimension_numbers = #tpu.dot_dimension_numbers<[1], [0], [0], [1], [0, 0, 1, 1], [], []>} : vector<8x64xbf16>, vector<64x256xbf16>, vector<8x256xf32> -> vector<8x256xf32>
    %298 = arith.addf %295, %297 : vector<8x256xf32>
    %299 = vector.extract_strided_slice %298 {offsets = [0, 0], sizes = [8, 128], strides = [1, 1]} : vector<8x256xf32> to vector<8x128xf32>
    %300 = arith.negf %299 : vector<8x128xf32>
    %301 = math.exp %300 : vector<8x128xf32>
    %cst_69 = arith.constant 1.000000e+00 : f32
    %302 = vector.broadcast %cst_69 : f32 to vector<8x128xf32>
    %303 = arith.addf %302, %301 : vector<8x128xf32>
    %304 = arith.divf %302, %303 : vector<8x128xf32>
    %305 = vector.extract_strided_slice %304 {offsets = [0, 0], sizes = [8, 64], strides = [1, 1]} : vector<8x128xf32> to vector<8x64xf32>
    %306 = vector.extract_strided_slice %304 {offsets = [0, 64], sizes = [8, 64], strides = [1, 1]} : vector<8x128xf32> to vector<8x64xf32>
    %307 = vector.extract_strided_slice %298 {offsets = [0, 128], sizes = [8, 64], strides = [1, 1]} : vector<8x256xf32> to vector<8x64xf32>
    %308 = math.tanh %307 : vector<8x64xf32>
    %309 = vector.extract_strided_slice %298 {offsets = [0, 192], sizes = [8, 64], strides = [1, 1]} : vector<8x256xf32> to vector<8x64xf32>
    %310 = arith.negf %309 : vector<8x64xf32>
    %311 = math.exp %310 : vector<8x64xf32>
    %cst_70 = arith.constant 1.000000e+00 : f32
    %312 = vector.broadcast %cst_70 : f32 to vector<8x64xf32>
    %313 = arith.addf %312, %311 : vector<8x64xf32>
    %314 = arith.divf %312, %313 : vector<8x64xf32>
    %315 = arith.mulf %306, %264 : vector<8x64xf32>
    %316 = arith.mulf %305, %308 : vector<8x64xf32>
    %317 = arith.addf %315, %316 : vector<8x64xf32>
    %318 = math.tanh %317 : vector<8x64xf32>
    %319 = arith.mulf %314, %318 : vector<8x64xf32>
    %320 = tpu.concatenate %319, %291 in 1 : vector<8x64xf32>, vector<8x64xf32> -> vector<8x128xf32>
    %321 = arith.truncf %320 : vector<8x128xf32> to vector<8x128xbf16>
    %cst_71 = arith.constant dense<0.000000e+00> : vector<8x256xf32>
    %322 = tpu.matmul %321, %4, %cst_71 {dimension_numbers = #tpu.dot_dimension_numbers<[1], [0], [0], [1], [0, 0, 1, 1], [], []>} : vector<8x128xbf16>, vector<128x256xbf16>, vector<8x256xf32> -> vector<8x256xf32>
    %323 = arith.addf %322, %7 : vector<8x256xf32>
    %324 = vector.extract_strided_slice %323 {offsets = [0, 0], sizes = [8, 128], strides = [1, 1]} : vector<8x256xf32> to vector<8x128xf32>
    %325 = arith.negf %324 : vector<8x128xf32>
    %326 = math.exp %325 : vector<8x128xf32>
    %cst_72 = arith.constant 1.000000e+00 : f32
    %327 = vector.broadcast %cst_72 : f32 to vector<8x128xf32>
    %328 = arith.addf %327, %326 : vector<8x128xf32>
    %329 = arith.divf %327, %328 : vector<8x128xf32>
    %330 = vector.extract_strided_slice %329 {offsets = [0, 0], sizes = [8, 64], strides = [1, 1]} : vector<8x128xf32> to vector<8x64xf32>
    %331 = vector.extract_strided_slice %329 {offsets = [0, 64], sizes = [8, 64], strides = [1, 1]} : vector<8x128xf32> to vector<8x64xf32>
    %332 = vector.extract_strided_slice %323 {offsets = [0, 128], sizes = [8, 64], strides = [1, 1]} : vector<8x256xf32> to vector<8x64xf32>
    %333 = math.tanh %332 : vector<8x64xf32>
    %334 = vector.extract_strided_slice %323 {offsets = [0, 192], sizes = [8, 64], strides = [1, 1]} : vector<8x256xf32> to vector<8x64xf32>
    %335 = arith.negf %334 : vector<8x64xf32>
    %336 = math.exp %335 : vector<8x64xf32>
    %cst_73 = arith.constant 1.000000e+00 : f32
    %337 = vector.broadcast %cst_73 : f32 to vector<8x64xf32>
    %338 = arith.addf %337, %336 : vector<8x64xf32>
    %339 = arith.divf %337, %338 : vector<8x64xf32>
    %340 = arith.mulf %331, %289 : vector<8x64xf32>
    %341 = arith.mulf %330, %333 : vector<8x64xf32>
    %342 = arith.addf %340, %341 : vector<8x64xf32>
    %343 = math.tanh %342 : vector<8x64xf32>
    %344 = arith.mulf %339, %343 : vector<8x64xf32>
    %c6_i32 = arith.constant 6 : i32
    %345 = arith.index_cast %c6_i32 : i32 to index
    %c0_74 = arith.constant 0 : index
    %c0_75 = arith.constant 0 : index
    %346 = vector.load %arg11[%345, %c0_74, %c0_75] : memref<8x8x256xbf16, #tpu.memory_space<vmem>>, vector<1x8x256xbf16>
    %347 = vector.shape_cast %346 : vector<1x8x256xbf16> to vector<8x256xbf16>
    %348 = arith.extf %347 : vector<8x256xbf16> to vector<8x256xf32>
    %349 = arith.truncf %319 : vector<8x64xf32> to vector<8x64xbf16>
    %cst_76 = arith.constant dense<0.000000e+00> : vector<8x256xf32>
    %350 = tpu.matmul %349, %3, %cst_76 {dimension_numbers = #tpu.dot_dimension_numbers<[1], [0], [0], [1], [0, 0, 1, 1], [], []>} : vector<8x64xbf16>, vector<64x256xbf16>, vector<8x256xf32> -> vector<8x256xf32>
    %351 = arith.addf %348, %350 : vector<8x256xf32>
    %352 = vector.extract_strided_slice %351 {offsets = [0, 0], sizes = [8, 128], strides = [1, 1]} : vector<8x256xf32> to vector<8x128xf32>
    %353 = arith.negf %352 : vector<8x128xf32>
    %354 = math.exp %353 : vector<8x128xf32>
    %cst_77 = arith.constant 1.000000e+00 : f32
    %355 = vector.broadcast %cst_77 : f32 to vector<8x128xf32>
    %356 = arith.addf %355, %354 : vector<8x128xf32>
    %357 = arith.divf %355, %356 : vector<8x128xf32>
    %358 = vector.extract_strided_slice %357 {offsets = [0, 0], sizes = [8, 64], strides = [1, 1]} : vector<8x128xf32> to vector<8x64xf32>
    %359 = vector.extract_strided_slice %357 {offsets = [0, 64], sizes = [8, 64], strides = [1, 1]} : vector<8x128xf32> to vector<8x64xf32>
    %360 = vector.extract_strided_slice %351 {offsets = [0, 128], sizes = [8, 64], strides = [1, 1]} : vector<8x256xf32> to vector<8x64xf32>
    %361 = math.tanh %360 : vector<8x64xf32>
    %362 = vector.extract_strided_slice %351 {offsets = [0, 192], sizes = [8, 64], strides = [1, 1]} : vector<8x256xf32> to vector<8x64xf32>
    %363 = arith.negf %362 : vector<8x64xf32>
    %364 = math.exp %363 : vector<8x64xf32>
    %cst_78 = arith.constant 1.000000e+00 : f32
    %365 = vector.broadcast %cst_78 : f32 to vector<8x64xf32>
    %366 = arith.addf %365, %364 : vector<8x64xf32>
    %367 = arith.divf %365, %366 : vector<8x64xf32>
    %368 = arith.mulf %359, %317 : vector<8x64xf32>
    %369 = arith.mulf %358, %361 : vector<8x64xf32>
    %370 = arith.addf %368, %369 : vector<8x64xf32>
    %371 = math.tanh %370 : vector<8x64xf32>
    %372 = arith.mulf %367, %371 : vector<8x64xf32>
    %373 = tpu.concatenate %372, %344 in 1 : vector<8x64xf32>, vector<8x64xf32> -> vector<8x128xf32>
    %374 = arith.truncf %373 : vector<8x128xf32> to vector<8x128xbf16>
    %cst_79 = arith.constant dense<0.000000e+00> : vector<8x256xf32>
    %375 = tpu.matmul %374, %4, %cst_79 {dimension_numbers = #tpu.dot_dimension_numbers<[1], [0], [0], [1], [0, 0, 1, 1], [], []>} : vector<8x128xbf16>, vector<128x256xbf16>, vector<8x256xf32> -> vector<8x256xf32>
    %376 = arith.addf %375, %7 : vector<8x256xf32>
    %377 = vector.extract_strided_slice %376 {offsets = [0, 0], sizes = [8, 128], strides = [1, 1]} : vector<8x256xf32> to vector<8x128xf32>
    %378 = arith.negf %377 : vector<8x128xf32>
    %379 = math.exp %378 : vector<8x128xf32>
    %cst_80 = arith.constant 1.000000e+00 : f32
    %380 = vector.broadcast %cst_80 : f32 to vector<8x128xf32>
    %381 = arith.addf %380, %379 : vector<8x128xf32>
    %382 = arith.divf %380, %381 : vector<8x128xf32>
    %383 = vector.extract_strided_slice %382 {offsets = [0, 0], sizes = [8, 64], strides = [1, 1]} : vector<8x128xf32> to vector<8x64xf32>
    %384 = vector.extract_strided_slice %382 {offsets = [0, 64], sizes = [8, 64], strides = [1, 1]} : vector<8x128xf32> to vector<8x64xf32>
    %385 = vector.extract_strided_slice %376 {offsets = [0, 128], sizes = [8, 64], strides = [1, 1]} : vector<8x256xf32> to vector<8x64xf32>
    %386 = math.tanh %385 : vector<8x64xf32>
    %387 = vector.extract_strided_slice %376 {offsets = [0, 192], sizes = [8, 64], strides = [1, 1]} : vector<8x256xf32> to vector<8x64xf32>
    %388 = arith.negf %387 : vector<8x64xf32>
    %389 = math.exp %388 : vector<8x64xf32>
    %cst_81 = arith.constant 1.000000e+00 : f32
    %390 = vector.broadcast %cst_81 : f32 to vector<8x64xf32>
    %391 = arith.addf %390, %389 : vector<8x64xf32>
    %392 = arith.divf %390, %391 : vector<8x64xf32>
    %393 = arith.mulf %384, %342 : vector<8x64xf32>
    %394 = arith.mulf %383, %386 : vector<8x64xf32>
    %395 = arith.addf %393, %394 : vector<8x64xf32>
    %396 = math.tanh %395 : vector<8x64xf32>
    %397 = arith.mulf %392, %396 : vector<8x64xf32>
    %c7_i32 = arith.constant 7 : i32
    %398 = arith.index_cast %c7_i32 : i32 to index
    %c0_82 = arith.constant 0 : index
    %c0_83 = arith.constant 0 : index
    %399 = vector.load %arg11[%398, %c0_82, %c0_83] : memref<8x8x256xbf16, #tpu.memory_space<vmem>>, vector<1x8x256xbf16>
    %400 = vector.shape_cast %399 : vector<1x8x256xbf16> to vector<8x256xbf16>
    %401 = arith.extf %400 : vector<8x256xbf16> to vector<8x256xf32>
    %402 = arith.truncf %372 : vector<8x64xf32> to vector<8x64xbf16>
    %cst_84 = arith.constant dense<0.000000e+00> : vector<8x256xf32>
    %403 = tpu.matmul %402, %3, %cst_84 {dimension_numbers = #tpu.dot_dimension_numbers<[1], [0], [0], [1], [0, 0, 1, 1], [], []>} : vector<8x64xbf16>, vector<64x256xbf16>, vector<8x256xf32> -> vector<8x256xf32>
    %404 = arith.addf %401, %403 : vector<8x256xf32>
    %405 = vector.extract_strided_slice %404 {offsets = [0, 0], sizes = [8, 128], strides = [1, 1]} : vector<8x256xf32> to vector<8x128xf32>
    %406 = arith.negf %405 : vector<8x128xf32>
    %407 = math.exp %406 : vector<8x128xf32>
    %cst_85 = arith.constant 1.000000e+00 : f32
    %408 = vector.broadcast %cst_85 : f32 to vector<8x128xf32>
    %409 = arith.addf %408, %407 : vector<8x128xf32>
    %410 = arith.divf %408, %409 : vector<8x128xf32>
    %411 = vector.extract_strided_slice %410 {offsets = [0, 0], sizes = [8, 64], strides = [1, 1]} : vector<8x128xf32> to vector<8x64xf32>
    %412 = vector.extract_strided_slice %410 {offsets = [0, 64], sizes = [8, 64], strides = [1, 1]} : vector<8x128xf32> to vector<8x64xf32>
    %413 = vector.extract_strided_slice %404 {offsets = [0, 128], sizes = [8, 64], strides = [1, 1]} : vector<8x256xf32> to vector<8x64xf32>
    %414 = math.tanh %413 : vector<8x64xf32>
    %415 = vector.extract_strided_slice %404 {offsets = [0, 192], sizes = [8, 64], strides = [1, 1]} : vector<8x256xf32> to vector<8x64xf32>
    %416 = arith.negf %415 : vector<8x64xf32>
    %417 = math.exp %416 : vector<8x64xf32>
    %cst_86 = arith.constant 1.000000e+00 : f32
    %418 = vector.broadcast %cst_86 : f32 to vector<8x64xf32>
    %419 = arith.addf %418, %417 : vector<8x64xf32>
    %420 = arith.divf %418, %419 : vector<8x64xf32>
    %421 = arith.mulf %412, %370 : vector<8x64xf32>
    %422 = arith.mulf %411, %414 : vector<8x64xf32>
    %423 = arith.addf %421, %422 : vector<8x64xf32>
    %424 = math.tanh %423 : vector<8x64xf32>
    %425 = arith.mulf %420, %424 : vector<8x64xf32>
    %426 = tpu.concatenate %425, %397 in 1 : vector<8x64xf32>, vector<8x64xf32> -> vector<8x128xf32>
    %427 = arith.truncf %426 : vector<8x128xf32> to vector<8x128xbf16>
    %cst_87 = arith.constant dense<0.000000e+00> : vector<8x256xf32>
    %428 = tpu.matmul %427, %4, %cst_87 {dimension_numbers = #tpu.dot_dimension_numbers<[1], [0], [0], [1], [0, 0, 1, 1], [], []>} : vector<8x128xbf16>, vector<128x256xbf16>, vector<8x256xf32> -> vector<8x256xf32>
    %429 = arith.addf %428, %7 : vector<8x256xf32>
    %430 = vector.extract_strided_slice %429 {offsets = [0, 0], sizes = [8, 128], strides = [1, 1]} : vector<8x256xf32> to vector<8x128xf32>
    %431 = arith.negf %430 : vector<8x128xf32>
    %432 = math.exp %431 : vector<8x128xf32>
    %cst_88 = arith.constant 1.000000e+00 : f32
    %433 = vector.broadcast %cst_88 : f32 to vector<8x128xf32>
    %434 = arith.addf %433, %432 : vector<8x128xf32>
    %435 = arith.divf %433, %434 : vector<8x128xf32>
    %436 = vector.extract_strided_slice %435 {offsets = [0, 0], sizes = [8, 64], strides = [1, 1]} : vector<8x128xf32> to vector<8x64xf32>
    %437 = vector.extract_strided_slice %435 {offsets = [0, 64], sizes = [8, 64], strides = [1, 1]} : vector<8x128xf32> to vector<8x64xf32>
    %438 = vector.extract_strided_slice %429 {offsets = [0, 128], sizes = [8, 64], strides = [1, 1]} : vector<8x256xf32> to vector<8x64xf32>
    %439 = math.tanh %438 : vector<8x64xf32>
    %440 = vector.extract_strided_slice %429 {offsets = [0, 192], sizes = [8, 64], strides = [1, 1]} : vector<8x256xf32> to vector<8x64xf32>
    %441 = arith.negf %440 : vector<8x64xf32>
    %442 = math.exp %441 : vector<8x64xf32>
    %cst_89 = arith.constant 1.000000e+00 : f32
    %443 = vector.broadcast %cst_89 : f32 to vector<8x64xf32>
    %444 = arith.addf %443, %442 : vector<8x64xf32>
    %445 = arith.divf %443, %444 : vector<8x64xf32>
    %446 = arith.mulf %437, %395 : vector<8x64xf32>
    %447 = arith.mulf %436, %439 : vector<8x64xf32>
    %448 = arith.addf %446, %447 : vector<8x64xf32>
    %449 = math.tanh %448 : vector<8x64xf32>
    %450 = arith.mulf %445, %449 : vector<8x64xf32>
    %c8_i32 = arith.constant 8 : i32
    %c0_90 = arith.constant 0 : index
    %c0_91 = arith.constant 0 : index
    %c0_92 = arith.constant 0 : index
    %451 = vector.load %arg12[%c0_90, %c0_91, %c0_92] : memref<4x8x64xf32, #tpu.memory_space<vmem>>, vector<1x8x64xf32>
    %452 = vector.shape_cast %451 : vector<1x8x64xf32> to vector<8x64xf32>
    %453 = vector.shape_cast %425 : vector<8x64xf32> to vector<1x8x64xf32>
    tpu.vector_store %arg12[%c0_90, %c0_91, %c0_92], %453 {strides = array<i32>} : memref<4x8x64xf32, #tpu.memory_space<vmem>>, vector<1x8x64xf32>,
    %c1_93 = arith.constant 1 : index
    %c0_94 = arith.constant 0 : index
    %c0_95 = arith.constant 0 : index
    %454 = vector.load %arg12[%c1_93, %c0_94, %c0_95] : memref<4x8x64xf32, #tpu.memory_space<vmem>>, vector<1x8x64xf32>
    %455 = vector.shape_cast %454 : vector<1x8x64xf32> to vector<8x64xf32>
    %456 = vector.shape_cast %423 : vector<8x64xf32> to vector<1x8x64xf32>
    tpu.vector_store %arg12[%c1_93, %c0_94, %c0_95], %456 {strides = array<i32>} : memref<4x8x64xf32, #tpu.memory_space<vmem>>, vector<1x8x64xf32>,
    %c2_96 = arith.constant 2 : index
    %c0_97 = arith.constant 0 : index
    %c0_98 = arith.constant 0 : index
    %457 = vector.load %arg12[%c2_96, %c0_97, %c0_98] : memref<4x8x64xf32, #tpu.memory_space<vmem>>, vector<1x8x64xf32>
    %458 = vector.shape_cast %457 : vector<1x8x64xf32> to vector<8x64xf32>
    %459 = vector.shape_cast %450 : vector<8x64xf32> to vector<1x8x64xf32>
    tpu.vector_store %arg12[%c2_96, %c0_97, %c0_98], %459 {strides = array<i32>} : memref<4x8x64xf32, #tpu.memory_space<vmem>>, vector<1x8x64xf32>,
    %c3_99 = arith.constant 3 : index
    %c0_100 = arith.constant 0 : index
    %c0_101 = arith.constant 0 : index
    %460 = vector.load %arg12[%c3_99, %c0_100, %c0_101] : memref<4x8x64xf32, #tpu.memory_space<vmem>>, vector<1x8x64xf32>
    %461 = vector.shape_cast %460 : vector<1x8x64xf32> to vector<8x64xf32>
    %462 = vector.shape_cast %448 : vector<8x64xf32> to vector<1x8x64xf32>
    tpu.vector_store %arg12[%c3_99, %c0_100, %c0_101], %462 {strides = array<i32>} : memref<4x8x64xf32, #tpu.memory_space<vmem>>, vector<1x8x64xf32>,
    %c0_i32_102 = arith.constant 0 : i32
    %463 = arith.cmpi eq, %arg1, %c0_i32_102 : i32
    %464 = arith.extui %463 : i1 to i32
    %c0_i32_103 = arith.constant 0 : i32
    %465 = arith.cmpi ne, %464, %c0_i32_103 : i32
    scf.if %465 {
      %c0_104 = arith.constant 0 : index
      %c0_105 = arith.constant 0 : index
      %466 = vector.load %arg8[%c0_104, %c0_105] : memref<8x64xf32, #tpu.memory_space<vmem>>, vector<8x64xf32>
      %cst_106 = arith.constant dense<0.000000e+00> : vector<8x8xf32>
      %467 = tpu.matmul %466, %450, %cst_106 {dimension_numbers = #tpu.dot_dimension_numbers<[1], [1], [0], [0], [0, 0, 1, 0], [], []>} : vector<8x64xf32>, vector<8x64xf32>, vector<8x8xf32> -> vector<8x8xf32>
      %468 = vector.extract_strided_slice %467 {offsets = [0, 0], sizes = [1, 8], strides = [1, 1]} : vector<8x8xf32> to vector<1x8xf32>
      %c0_107 = arith.constant 0 : index
      %c0_108 = arith.constant 0 : index
      %469 = vector.load %arg9[%c0_107, %c0_108] : memref<1x1xf32, #tpu.memory_space<vmem>>, vector<1x1xf32>
      %470 = vector.broadcast %469 : vector<1x1xf32> to vector<1x8xf32>
      %471 = arith.addf %468, %470 : vector<1x8xf32>
      %472 = arith.negf %471 : vector<1x8xf32>
      %473 = math.exp %472 : vector<1x8xf32>
      %cst_109 = arith.constant 1.000000e+00 : f32
      %474 = vector.broadcast %cst_109 : f32 to vector<1x8xf32>
      %475 = arith.addf %474, %473 : vector<1x8xf32>
      %476 = arith.divf %474, %475 : vector<1x8xf32>
      %477 = vector.shape_cast %476 : vector<1x8xf32> to vector<1x1x8xf32>
      %c0_110 = arith.constant 0 : index
      %c0_111 = arith.constant 0 : index
      %c0_112 = arith.constant 0 : index
      %478 = vector.load %arg10[%c0_110, %c0_111, %c0_112] : memref<1x1x8xf32, #tpu.memory_space<vmem>>, vector<1x1x8xf32>
      tpu.vector_store %arg10[%c0_110, %c0_111, %c0_112], %477 {strides = array<i32>} : memref<1x1x8xf32, #tpu.memory_space<vmem>>, vector<1x1x8xf32>,
    } else {
    }
    return
  }
  func.func @transform_0(%arg0: i32, %arg1: i32) -> (i32, i32, i32) {
    %c0_i32 = arith.constant 0 : i32
    %c0_i32_0 = arith.constant 0 : i32
    return %arg1, %arg0, %c0_i32 : i32, i32, i32
  }
  func.func @transform_1(%arg0: i32, %arg1: i32) -> (i32, i32) {
    %c0_i32 = arith.constant 0 : i32
    %c0_i32_0 = arith.constant 0 : i32
    %c0_i32_1 = arith.constant 0 : i32
    return %c0_i32, %c0_i32_0 : i32, i32
  }
  func.func @transform_2(%arg0: i32, %arg1: i32) -> (i32, i32) {
    %c0_i32 = arith.constant 0 : i32
    %c0_i32_0 = arith.constant 0 : i32
    %c0_i32_1 = arith.constant 0 : i32
    return %c0_i32, %c0_i32_0 : i32, i32
  }
  func.func @transform_3(%arg0: i32, %arg1: i32) -> (i32, i32) {
    %c0_i32 = arith.constant 0 : i32
    %c0_i32_0 = arith.constant 0 : i32
    %c0_i32_1 = arith.constant 0 : i32
    return %c0_i32, %c0_i32_0 : i32, i32
  }
  func.func @transform_4(%arg0: i32, %arg1: i32) -> (i32, i32) {
    %c0_i32 = arith.constant 0 : i32
    %c0_i32_0 = arith.constant 0 : i32
    %c0_i32_1 = arith.constant 0 : i32
    return %c0_i32, %c0_i32_0 : i32, i32
  }
  func.func @transform_5(%arg0: i32, %arg1: i32) -> (i32, i32) {
    %c0_i32 = arith.constant 0 : i32
    %c0_i32_0 = arith.constant 0 : i32
    %c0_i32_1 = arith.constant 0 : i32
    return %c0_i32, %c0_i32_0 : i32, i32
  }
  func.func @transform_6(%arg0: i32, %arg1: i32) -> (i32, i32) {
    %c0_i32 = arith.constant 0 : i32
    %c0_i32_0 = arith.constant 0 : i32
    %c0_i32_1 = arith.constant 0 : i32
    return %c0_i32, %c0_i32_0 : i32, i32
  }
  func.func @transform_7(%arg0: i32, %arg1: i32) -> (i32, i32) {
    %c0_i32 = arith.constant 0 : i32
    %c0_i32_0 = arith.constant 0 : i32
    %c0_i32_1 = arith.constant 0 : i32
    return %c0_i32, %c0_i32_0 : i32, i32
  }
  func.func @transform_8(%arg0: i32, %arg1: i32) -> (i32, i32, i32) {
    %c0_i32 = arith.constant 0 : i32
    %c0_i32_0 = arith.constant 0 : i32
    %c0_i32_1 = arith.constant 0 : i32
    return %arg0, %c0_i32, %c0_i32_0 : i32, i32, i32
  }
}

</mosaic_0001>

<bundles_post_ra>
// kernel: tpu_custom_call.1
= control target key start
LH: loop header
LB: loop body
LE: loop exit
PB: predicated region body
PF: predicated region fallthrough
CT: control target
= control target key end

     0   :  { %s2920_s0 = inlined_call_operand.hbm [shape: f32[8,8,16], index: 0, kind: input, shape index: {}]   ;;  %s2921_s1 = inlined_call_operand.hbm [shape: bf16[16,256], index: 1, kind: input, shape index: {}]   ;;  %s2922_s2 = inlined_call_operand.hbm [shape: bf16[64,256], index: 2, kind: input, shape index: {}]   ;;  %s2923_s3 = inlined_call_operand.vmem [shape: f32[1,256], index: 3, kind: input, shape index: {}]   ;;  %s2924_s4 = inlined_call_operand.hbm [shape: bf16[128,256], index: 4, kind: input, shape index: {}]   ;;  %s2925_s5 = inlined_call_operand.vmem [shape: f32[1,256], index: 5, kind: input, shape index: {}]   ;;  %s2926_s6 = inlined_call_operand.vmem [shape: f32[8,64], index: 6, kind: input, shape index: {}]   ;;  %s2927_s7 = inlined_call_operand.<no memory space> [shape: f32[1,1], index: 7, kind: input, shape index: {}]   ;;  %s2928_s8 = inlined_call_operand.hbm [shape: f32[1,1,8], index: 8, kind: output, shape index: {}]  }
   0x1   :  { %v13_v0 = vstv %s2927_s7 }
   0x2   :  { %14 = vst [vmem:[#allocation4] sm:$0x1] %v13_v0 }
   0x3   :  { %15 = vsyncpa [#allocation6], 0 }
   0x4   :  { %16 = vsyncpa [#allocation9], 0 }
   0x5   :  { %17 = vsyncpa [#allocation12], 0 }
   0x6   :  { %18 = vsyncpa [#allocation7], 0  ;;  %s2244_s29 = smov [#allocation8]   ;;  %s2245_s9 = smov [#allocation5]  }
   0x7   :  { %s36_s30 = sshll.u32 %s2244_s29, 4  ;;  %s24_s10 = sshll.u32 %s2245_s9, 4  ;;  %s37_s30 = int_to_ptr.vmem [resolvable:$true] %s36_s30  ;;  %s2303_s10 = int_to_ptr.vmem [resolvable:$true] %s24_s10 }
   0x8   :  { %s2126_s13 = scalar_lea.hbm %s2921_s1, 256 }
   0x9   :  { %p2127_p0 = scmp.ne.s32.totalorder %s2921_s1, %s2126_s13  ;;  %p2130_p1 = scmp.lt.u32.totalorder %s2126_s13, %s2921_s1 }
   0xb   :  { %p2132_p2 = pnand %p2130_p1, %p2127_p0 }
   0xd   :  { %2135 = shalt.err (!%p2132_p2)
}
   0xe   :  { %s2136_s17 = scalar_lea.vmem %s37_s30, 256  ;;  %p2141_p4 = scmp.lt.s32.totalorder %s37_s30, %s37_s30 }
   0xf   :  { %p2137_p3 = scmp.ne.s32.totalorder %s37_s30, %s2136_s17  ;;  %p2142_p5 = scmp.lt.s32.totalorder %s2136_s17, %s2136_s17 }
  0x11   :  { %p2143_p6 = por %p2142_p5, %p2141_p4 }
  0x13   :  { %p2144_p7 = pnand %p2143_p6, %p2137_p3 }
  0x15   :  { %2147 = shalt.err (!%p2144_p7)
}
  0x16   :  { %s2246_s18 = smov 128   ;;  %s2247_s19 = smov 8  }
  0x17   :  { %42 = dma.hbm_to_vmem [thread:$0]  %s2921_s1, 256, %s37_s30, [#allocation9], %s2246_s18, %s2246_s18, %s2247_s19  }
  0x18   :  { %s2148_s24 = scalar_lea.hbm %s2920_s0, 1024 }
  0x19   :  { %p2149_p8 = scmp.ne.s32.totalorder %s2920_s0, %s2148_s24  ;;  %p2152_p9 = scmp.lt.u32.totalorder %s2148_s24, %s2920_s0 }
  0x1b   :  { %p2154_p10 = pnand %p2152_p9, %p2149_p8 }
  0x1d   :  { %2157 = shalt.err (!%p2154_p10)
}
  0x1e   :  { %s2158_s29 = scalar_lea.vmem %s2303_s10, 1024  ;;  %p2163_p12 = scmp.lt.s32.totalorder %s2303_s10, %s2303_s10 }
  0x1f   :  { %p2159_p11 = scmp.ne.s32.totalorder %s2303_s10, %s2158_s29  ;;  %p2164_p13 = scmp.lt.s32.totalorder %s2158_s29, %s2158_s29 }
  0x21   :  { %p2165_p0 = por %p2164_p13, %p2163_p12 }
  0x23   :  { %p2166_p1 = pnand %p2165_p0, %p2159_p11 }
  0x25   :  { %2169 = shalt.err (!%p2166_p1)
}
  0x26   :  { %30 = dma.hbm_to_vmem [thread:$0]  %s2920_s0, 1024, %s2303_s10, [#allocation6], %s2246_s18, %s2246_s18, %s2247_s19  }
  0x27   :  { %s2248_s9 = smov [#allocation10]   ;;  %s2249_s12 = smov [#allocation11]  }
  0x28   :  { %s48_s11 = sshll.u32 %s2248_s9, 4  ;;  %s62_s13 = sshll.u32 %s2249_s12, 4  ;;  %s49_s11 = int_to_ptr.vmem [resolvable:$true] %s48_s11  ;;  %s2340_s13 = int_to_ptr.vmem [resolvable:$true] %s62_s13 }
  0x29   :  { %s2170_s7 = scalar_lea.hbm %s2922_s2, 1024 }
  0x2a   :  { %p2171_p2 = scmp.ne.s32.totalorder %s2922_s2, %s2170_s7  ;;  %p2174_p3 = scmp.lt.u32.totalorder %s2170_s7, %s2922_s2 }
  0x2c   :  { %p2176_p4 = pnand %p2174_p3, %p2171_p2 }
  0x2e   :  { %2179 = shalt.err (!%p2176_p4)
}
  0x2f   :  { %s2180_s0 = scalar_lea.vmem %s49_s11, 1024  ;;  %p2185_p6 = scmp.lt.s32.totalorder %s49_s11, %s49_s11 }
  0x30   :  { %p2181_p5 = scmp.ne.s32.totalorder %s49_s11, %s2180_s0  ;;  %p2186_p7 = scmp.lt.s32.totalorder %s2180_s0, %s2180_s0 }
  0x32   :  { %p2187_p8 = por %p2186_p7, %p2185_p6 }
  0x34   :  { %p2188_p9 = pnand %p2187_p8, %p2181_p5 }
  0x36   :  { %2191 = shalt.err (!%p2188_p9)
}
  0x37   :  { %54 = dma.hbm_to_vmem [thread:$0]  %s2922_s2, 1024, %s49_s11, [#allocation9], %s2246_s18, %s2246_s18, %s2247_s19  }
  0x38   :  { %s2192_s25 = scalar_lea.hbm %s2924_s4, 2048 }
  0x39   :  { %p2193_p10 = scmp.ne.s32.totalorder %s2924_s4, %s2192_s25  ;;  %p2196_p11 = scmp.lt.u32.totalorder %s2192_s25, %s2924_s4 }
  0x3b   :  { %p2198_p12 = pnand %p2196_p11, %p2193_p10 }
  0x3d   :  { %2201 = shalt.err (!%p2198_p12)
}
  0x3e   :  { %s2202_s1 = scalar_lea.vmem %s2340_s13, 2048  ;;  %p2207_p0 = scmp.lt.s32.totalorder %s2340_s13, %s2340_s13 }
  0x3f   :  { %p2203_p13 = scmp.ne.s32.totalorder %s2340_s13, %s2202_s1  ;;  %p2208_p1 = scmp.lt.s32.totalorder %s2202_s1, %s2202_s1 }
  0x41   :  { %p2209_p2 = por %p2208_p1, %p2207_p0 }
  0x43   :  { %p2210_p3 = pnand %p2209_p2, %p2203_p13 }
  0x45   :  { %2213 = shalt.err (!%p2210_p3)
}
  0x46   :  { %68 = dma.hbm_to_vmem [thread:$0]  %s2924_s4, 2048, %s2340_s13, [#allocation12], %s2246_s18, %s2246_s18, %s2247_s19  }
  0x47   :  { %2236 = dma.done.wait [#allocation6], 1024  }
  0x48   :  { %2237 = vsyncadd [#allocation6], 4294966272 }
  0x49   :  { %2238 = dma.done.wait [#allocation9], 1280  }
  0x4a   :  { %2239 = vsyncadd [#allocation9], 4294966016 }
  0x4b   :  { %2240 = dma.done.wait [#allocation12], 2048  }
  0x4c   :  { %2241 = vsyncadd [#allocation12], 4294965248  ;;  %vm92_vm0 = vcmask 523264   ;;  %v2250_v1 = vmov 0   ;;  %v2251_v2 = vmov 0.0   ;;  %v133_v9 = vld [vmem:[#allocation5] sm:$0xff]  ;;  %v123_v19 = vlaneseq }
  0x4d   :  { %214 = vmatprep.mubr.bf16.mxu0 %v2250_v1  ;;  %414 = vmatprep.mubr.bf16.mxu1 %v2250_v1  ;;  %93 = vst.msk [vmem:[#allocation3] sm:$0xff] %vm92_vm0, %v2251_v2  ;;  %94 = vst.msk [vmem:[#allocation3 + $0x8] sm:$0xff] %vm92_vm0, %v2251_v2  ;;  %v2388_v3 = vld [vmem:[#allocation10 + $0x4] ss:$8 sps:$4 sm:$0xff]   ;;  %v2390_v4 = vld [vmem:[#allocation10] ss:$8 sps:$4 sm:$0xff]  }
  0x4e   :  { %95 = vst.msk [vmem:[#allocation3 + $0x10] sm:$0xff] %vm92_vm0, %v2251_v2  ;;  %96 = vst.msk [vmem:[#allocation3 + $0x18] sm:$0xff] %vm92_vm0, %v2251_v2  ;;  %1866 = vset.pattern.permute.xlu0 %v2250_v1  ;;  %382 = vmatprep.subr.bf16.mxu1 %v2388_v3  ;;  %v1870_v5 = vld [vmem:[#allocation8 + $0x4] ss:$8 sps:$4 sm:$0xff]   ;;  %v1872_v6 = vld [vmem:[#allocation8] ss:$8 sps:$4 sm:$0xff]  }
  0x4f   :  { %383 = vmatpush1.bf16.msra.mxu1 %v2390_v4  ;;  %v2394_v7 = vld [vmem:[#allocation10 + $0x14] ss:$8 sps:$4 sm:$0xff]   ;;  %v2396_v8 = vld [vmem:[#allocation10 + $0x10] ss:$8 sps:$4 sm:$0xff]   ;;  %182 = vmatprep.subr.bf16.mxu0 %v1870_v5  ;;  %vm169_vm1 = vcmask 130048   ;;  %s2252_s4 = smov 64  }
  0x50   :  { %v134_v10 = vld [vmem:[#allocation5 + $0x8] sm:$0xff]  ;;  %183 = vmatpush1.bf16.msra.mxu0 %v1872_v6  ;;  %384 = vmatprep.subr.bf16.mxu1 %v2394_v7  ;;  %v2399_v12 = vld [vmem:[#allocation10 + $0x24] ss:$8 sps:$4 sm:$0xff]   ;;  %v2402_v13 = vld [vmem:[#allocation10 + $0x20] ss:$8 sps:$4 sm:$0xff]   ;;  %v2417_v20 = vshrl.u32 %v123_v19, 7 }
  0x51   :  { %v141_v11 = vpack.c.bf16 %v134_v10, %v133_v9  ;;  %v2406_v15 = vld [vmem:[#allocation10 + $0x34] ss:$8 sps:$4 sm:$0xff]   ;;  %v2408_v16 = vld [vmem:[#allocation10 + $0x30] ss:$8 sps:$4 sm:$0xff]   ;;  %v2446_v50 = vld [vmem:[#allocation11 + $0x4] ss:$8 sps:$4 sm:$0xff]  }
  0x52   :  { %v2420_v21 = vsub.s32 0, %v2417_v20  ;;  %v147_v22 = vld [vmem:[%s2923_s3] sm:$0x3]  ;;  %v129_v23 = vsub.s32 1, %v2417_v20  ;;  %v2448_v51 = vld [vmem:[#allocation11] ss:$8 sps:$4 sm:$0xff]   ;;  %541 = vmatprep.subr.bf16.mxu0 %v2446_v50 }
  0x53   :  { %385 = vmatpush1.bf16.msra.mxu1 %v2396_v8  ;;  %1756 = vmatmul.mubr.msk.bf16.vlgmr.msra.gmra.mrb[0].mxu0 %vm169_vm1, %v141_v11  ;;  %v2450_v52 = vld [vmem:[#allocation11 + $0x14] ss:$8 sps:$4 sm:$0xff]   ;;  %v135_v53 = vld [vmem:[#allocation5 + $0x10] sm:$0xff]  ;;  %v136_v54 = vld [vmem:[#allocation5 + $0x18] sm:$0xff]  ;;  %vm2253_vm2 = vmmov 0   ;;  %vm1735_vm3 = vcmask 57344  }
  0x54   :  { %v329_v14 = vld [vmem:[#allocation3 + $0x8] sm:$0xff]  ;;  %386 = vmatprep.subr.bf16.mxu1 %v2399_v12  ;;  %v327_v17 = vld [vmem:[#allocation3] sm:$0xff]  ;;  %224 = vmatprep.mubr.bf16.mxu0 %v2250_v1  ;;  %v2427_v24 = vrot.slane %v147_v22, %v2420_v21  ;;  %v2431_v25 = vrot.slane %v147_v22, %v129_v23  ;;  %v142_v55 = vpack.c.bf16 %v136_v54, %v135_v53  ;;  %v2465_v60 = vld [vmem:[#allocation11 + $0x20] ss:$8 sps:$4 sm:$0xff]  }
  0x55   :  { %439 = vrot.lane.b32.xlu0 %v329_v14, %s2252_s4  ;;  %v337_v18 = vpack.c.bf16 %v327_v17, %v327_v17  ;;  %542 = vmatpush1.bf16.msra.mxu0 %v2448_v51  ;;  %v2455_v56 = vld [vmem:[#allocation11 + $0x10] ss:$8 sps:$4 sm:$0xff]   ;;  %v2460_v57 = vld [vmem:[#allocation11 + $0x24] ss:$8 sps:$4 sm:$0xff]   ;;  %v2469_v61 = vld [vmem:[#allocation11 + $0x34] ss:$8 sps:$4 sm:$0xff]  }
  0x56   :  { %543 = vmatprep.subr.bf16.mxu0 %v2450_v52  ;;  %v137_v58 = vld [vmem:[#allocation5 + $0x20] sm:$0xff]  ;;  %v138_v59 = vld [vmem:[#allocation5 + $0x28] sm:$0xff]  ;;  %v2478_v0 = vld [vmem:[#allocation11 + $0x44] ss:$8 sps:$4 sm:$0xff]  }
  0x57   :  { %387 = vmatpush1.bf16.msra.mxu1 %v2402_v13  ;;  %v143_v62 = vpack.c.bf16 %v138_v59, %v137_v58  ;;  %v2473_v63 = vld [vmem:[#allocation11 + $0x30] ss:$8 sps:$4 sm:$0xff]   ;;  %v139_v5 = vld [vmem:[#allocation5 + $0x30] sm:$0xff]  ;;  %v140_v6 = vld [vmem:[#allocation5 + $0x38] sm:$0xff] }
  0x58   :  { %388 = vmatprep.subr.bf16.mxu1 %v2406_v15  ;;  %v2483_v9 = vld [vmem:[#allocation11 + $0x40] ss:$8 sps:$4 sm:$0xff]   ;;  %v2487_v10 = vld [vmem:[#allocation11 + $0x54] ss:$8 sps:$4 sm:$0xff]   ;;  %v144_v11 = vpack.c.bf16 %v140_v6, %v139_v5  ;;  %v2491_v14 = vld [vmem:[#allocation11 + $0x50] ss:$8 sps:$4 sm:$0xff]  }
  0x59   :  { %544 = vmatpush1.bf16.msra.mxu0 %v2455_v56  ;;  %v2496_v17 = vld [vmem:[#allocation11 + $0x64] ss:$8 sps:$4 sm:$0xff]  }
  0x5a   :  { %545 = vmatprep.subr.bf16.mxu0 %v2460_v57 }
  0x5b   :  { %389 = vmatpush1.bf16.msra.mxu1 %v2408_v16  ;;  %1757 = vmatmul.mubr.msk.bf16.gmra.mrb[4].mxu0 %vm169_vm1, %v142_v55 }
  0x5c   :  { %690 = vmatprep.subr.bf16.mxu1 %v2446_v50  ;;  %234 = vmatprep.mubr.bf16.mxu0 %v2250_v1 }
  0x5d   :  { %546 = vmatpush1.bf16.msra.mxu0 %v2465_v60 }
  0x5e   :  { %1776 = vmatmul.mubr.msk.bf16.vlgmr.msra.gmra.mrb[0].mxu1 %vm92_vm0, %v337_v18  ;;  %547 = vmatprep.subr.bf16.mxu0 %v2469_v61  ;;  %v2501_v18 = vld [vmem:[#allocation11 + $0x60] ss:$8 sps:$4 sm:$0xff]  }
  0x5f   :  { %722 = vmatprep.mubr.bf16.mxu1 %v2250_v1  ;;  %691 = vmatpush1.bf16.msra.mxu1 %v2448_v51 }
  0x60   :  { %692 = vmatprep.subr.bf16.mxu1 %v2450_v52 }
  0x61   :  { %548 = vmatpush1.bf16.msra.mxu0 %v2473_v63 }
  0x62   :  { %549 = vmatprep.subr.bf16.mxu0 %v2478_v0 }
  0x63   :  { %693 = vmatpush1.bf16.msra.mxu1 %v2455_v56  ;;  %1758 = vmatmul.mubr.msk.bf16.gmra.mrb[8].mxu0 %vm169_vm1, %v143_v62 }
  0x64   :  { %694 = vmatprep.subr.bf16.mxu1 %v2460_v57  ;;  %244 = vmatprep.mubr.bf16.mxu0 %v2250_v1 }
  0x65   :  { %550 = vmatpush1.bf16.msra.mxu0 %v2483_v9 }
  0x66   :  { %551 = vmatprep.subr.bf16.mxu0 %v2487_v10 }
  0x67   :  { %695 = vmatpush1.bf16.msra.mxu1 %v2465_v60 }
  0x68   :  { %696 = vmatprep.subr.bf16.mxu1 %v2469_v61 }
  0x69   :  { %552 = vmatpush1.bf16.msra.mxu0 %v2491_v14 }
  0x6a   :  { %553 = vmatprep.subr.bf16.mxu0 %v2496_v17 }
  0x6b   :  { %697 = vmatpush1.bf16.msra.mxu1 %v2473_v63  ;;  %1759 = vmatmul.mubr.msk.bf16.gmra.mrb[12].mxu0 %vm169_vm1, %v144_v11 }
  0x6c   :  { %698 = vmatprep.subr.bf16.mxu1 %v2478_v0  ;;  %573 = vmatprep.mubr.bf16.mxu0 %v2250_v1 }
  0x6d   :  { %554 = vmatpush1.bf16.msra.mxu0 %v2501_v18 }
  0x6f   :  { %699 = vmatpush1.bf16.msra.mxu1 %v2483_v9 }
  0x70   :  { %700 = vmatprep.subr.bf16.mxu1 %v2487_v10 }
  0x73   :  { %701 = vmatpush1.bf16.msra.mxu1 %v2491_v14 }
  0x74   :  { %702 = vmatprep.subr.bf16.mxu1 %v2496_v17 }
  0x77   :  { %703 = vmatpush1.bf16.msra.mxu1 %v2501_v18 }
 0x126   :  { %v216_v26 = vpop.f32.mrb[0].mxu0 }
 0x127   :  { %v217_v27 = vadd.f32 %v216_v26, %v2427_v24  ;;  %v218_v28 = vpop.f32.mrb[1].mxu0  ;;  %v440_v26 = vpop.permute.xlu0 %439 }
 0x128   :  { %v219_v29 = vadd.f32 %v218_v28, %v2431_v25  ;;  %v220_v30 = vpop.f32.mrb[2].mxu0 }
 0x129   :  { %v221_v31 = vadd.f32 %v220_v30, %v2427_v24  ;;  %v222_v32 = vpop.f32.mrb[3].mxu0 }
 0x12a   :  { %v1835_v33 = vpack.c.bf16 %v219_v29, %v217_v27  ;;  %v223_v34 = vadd.f32 %v222_v32, %v2431_v25  ;;  %v2515_v32 = vld [vmem:[#allocation11 + $0x70] ss:$8 sps:$4 sm:$0xff]  }
 0x12c   :  { %v2437_v35 = vpack.c.bf16 %v223_v34, %v221_v31  ;;  %v335_v36 = vunpack.c.l.bf16 %v1835_v33  ;;  %v336_v38 = vunpack.c.h.bf16 %v1835_v33  ;;  %v2513_v31 = vld [vmem:[#allocation11 + $0x74] ss:$8 sps:$4 sm:$0xff]  }
 0x12d   :  { %555 = vmatprep.subr.bf16.mxu0 %v2513_v31  ;;  %704 = vmatprep.subr.bf16.mxu1 %v2513_v31 }
 0x12e   :  { %556 = vmatpush1.bf16.msra.mxu0 %v2515_v32  ;;  %705 = vmatpush1.bf16.msra.mxu1 %v2515_v32 }
 0x12f   :  { %619 = vmatprep.subr.bf16.mxu0 %v2388_v3  ;;  %909 = vmatprep.subr.bf16.mxu1 %v2388_v3 }
 0x131   :  { %v416_v37 = vpop.f32.mrb[0].mxu1 }
 0x132   :  { %v423_v39 = vadd.f32 %v416_v37, %v335_v36  ;;  %v418_v40 = vpop.f32.mrb[1].mxu1  ;;  %v331_v36 = vld [vmem:[#allocation3 + $0x10] sm:$0xff] }
 0x133   :  { %v2439_v41 = vadd.f32 %v418_v40, %v336_v38  ;;  %v420_v42 = vpop.f32.mrb[2].mxu1  ;;  %v226_v40 = vpop.f32.mrb[4].mxu0 }
 0x134   :  { %v1777_v43 = vmul.f32 -1.442695, %v423_v39  ;;  %v421_v44 = vpop.f32.mrb[3].mxu1  ;;  %v228_v42 = vpop.f32.mrb[5].mxu0 }
 0x135   :  { %v1778_v19 = vmul.f32 -1.442695, %v2439_v41  ;;  %v230_v44 = vpop.f32.mrb[6].mxu0 }
 0x136   :  { %1906 = vpow2.f32 %v1777_v43  ;;  %v229_v43 = vadd.f32 %v228_v42, %v2431_v25 }
 0x137   :  { %1908 = vtanh.f32 %v2439_v41  ;;  %v227_v41 = vadd.f32 %v226_v40, %v2427_v24 }
 0x140   :  { %v1907_v45 = vpop.eup %1906 }
 0x141   :  { %v428_v46 = vadd.f32 1.0, %v1907_v45  ;;  %v1909_v47 = vpop.eup %1908  ;;  %v231_v45 = vadd.f32 %v230_v44, %v2427_v24 }
 0x143   :  { %1910 = vrcp.f32 %v428_v46  ;;  %v232_v46 = vpop.f32.mrb[7].mxu0 }
 0x144   :  { %1912 = vpow2.f32 %v1778_v19  ;;  %v236_v53 = vpop.f32.mrb[8].mxu0 }
 0x145   :  { %v237_v54 = vadd.f32 %v236_v53, %v2427_v24  ;;  %v238_v55 = vpop.f32.mrb[9].mxu0 }
 0x146   :  { %v239_v58 = vadd.f32 %v238_v55, %v2431_v25  ;;  %v240_v59 = vpop.f32.mrb[10].mxu0 }
 0x147   :  { %v241_v62 = vadd.f32 %v240_v59, %v2427_v24  ;;  %v242_v5 = vpop.f32.mrb[11].mxu0 }
 0x148   :  { %v2536_v6 = vpack.c.bf16 %v239_v58, %v237_v54  ;;  %v243_v11 = vadd.f32 %v242_v5, %v2431_v25  ;;  %v611_v54 = vunpack.c.h.bf16 %v2437_v35 }
 0x14a   :  { %v2539_v19 = vpack.c.bf16 %v243_v11, %v241_v62 }
 0x14d   :  { %v2442_v48 = vpop.eup %1910 }
 0x14e   :  { %v443_v49 = vmul.f32 %v2442_v48, %v1909_v47  ;;  %v1913_v22 = vpop.eup %1912  ;;  %v442_v28 = vmul.f32 %v2442_v48, %v440_v26  ;;  %v2528_v47 = vpack.c.bf16 %v229_v43, %v227_v41  ;;  %v233_v48 = vadd.f32 %v232_v46, %v2431_v25 }
 0x14f   :  { %v435_v27 = vadd.f32 1.0, %v1913_v22  ;;  %v246_v22 = vpop.f32.mrb[12].mxu0 }
 0x150   :  { %445 = vrot.lane.b32.xlu0 %v443_v49, %s2252_s4  ;;  %v2531_v49 = vpack.c.bf16 %v233_v48, %v231_v45  ;;  %v247_v26 = vadd.f32 %v246_v22, %v2427_v24  ;;  %v610_v48 = vunpack.c.l.bf16 %v2437_v35 }
 0x151   :  { %1914 = vrcp.f32 %v435_v27  ;;  %v248_v27 = vpop.f32.mrb[13].mxu0 }
 0x15b   :  { %v1915_v33 = vpop.eup %1914 }
 0x1c2   :  { %v446_v29 = vpop.permute.xlu0 %445 }
 0x1c3   :  { %v2510_v30 = vadd.f32 %v446_v29, %v442_v28  ;;  %v249_v28 = vadd.f32 %v248_v27, %v2431_v25  ;;  %v250_v29 = vpop.f32.mrb[14].mxu0 }
 0x1c5   :  { %1916 = vtanh.f32 %v2510_v30 }
 0x1cf   :  { %v1917_v34 = vpop.eup %1916 }
 0x1d0   :  { %v450_v37 = vmul.f32 %v1917_v34, %v1915_v33  ;;  %v251_v33 = vadd.f32 %v250_v29, %v2427_v24  ;;  %v252_v34 = vpop.f32.mrb[15].mxu0 }
 0x1d2   :  { %v1861_v38 = vpack.i.bf16 %v331_v36, %v450_v37  ;;  %v612_v39 = vpack.c.bf16 %v450_v37, %v450_v37  ;;  %v2544_v36 = vpack.c.bf16 %v249_v28, %v247_v26  ;;  %v253_v37 = vadd.f32 %v252_v34, %v2431_v25 }
 0x1d4   :  { %1862 = vrot.lane.b32.xlu1 %v1861_v38, %s2252_s4  ;;  %v2547_v38 = vpack.c.bf16 %v253_v37, %v251_v33 }
 0x1d8   :  { %614 = vrot.lane.b32.xlu1 %v612_v39, %s2252_s4 }
 0x246   :  { %v1863_v39 = vpop.permute.xlu1 %1862 }
 0x247   :  { %v1865_v40 = vunpack.i.h.bf16 %v1863_v39  ;;  %v1864_v41 = vunpack.i.l.bf16 %v1863_v39 }
 0x249   :  { %v459_v42 = vsel %vm92_vm0, %v1864_v41, %v1865_v40 }
 0x24a   :  { %v460_v43 = vpack.c.bf16 %v459_v42, %v459_v42  ;;  %v615_v24 = vpop.permute.xlu1 %614 }
 0x24c   :  { %574 = vmatmul.mubr.bf16.vlgmr.msra.gmra.mrb[16].mxu0 %v460_v43 }
 0x24d   :  { %620 = vmatpush1.bf16.msra.mxu0 %v2390_v4  ;;  %651 = vmatprep.mubr.bf16.mxu0 %v2250_v1 }
 0x24e   :  { %621 = vmatprep.subr.bf16.mxu0 %v2394_v7 }
 0x251   :  { %622 = vmatpush1.bf16.msra.mxu0 %v2396_v8 }
 0x252   :  { %623 = vmatprep.subr.bf16.mxu0 %v2399_v12 }
 0x255   :  { %624 = vmatpush1.bf16.msra.mxu0 %v2402_v13 }
 0x256   :  { %625 = vmatprep.subr.bf16.mxu0 %v2406_v15 }
 0x259   :  { %626 = vmatpush1.bf16.msra.mxu0 %v2408_v16 }
 0x25a   :  { %764 = vmatprep.subr.bf16.mxu0 %v2388_v3 }
 0x25c   :  { %1797 = vmatmul.mubr.msk.bf16.vlgmr.msra.gmra.mrb[20].mxu0 %vm92_vm0, %v615_v24 }
 0x25d   :  { %765 = vmatpush1.bf16.msra.mxu0 %v2390_v4  ;;  %796 = vmatprep.mubr.bf16.mxu0 %v2250_v1 }
 0x25e   :  { %766 = vmatprep.subr.bf16.mxu0 %v2394_v7 }
 0x261   :  { %767 = vmatpush1.bf16.msra.mxu0 %v2396_v8 }
 0x262   :  { %768 = vmatprep.subr.bf16.mxu0 %v2399_v12 }
 0x265   :  { %769 = vmatpush1.bf16.msra.mxu0 %v2402_v13 }
 0x266   :  { %770 = vmatprep.subr.bf16.mxu0 %v2406_v15 }
 0x269   :  { %771 = vmatpush1.bf16.msra.mxu0 %v2408_v16 }
 0x26a   :  { %835 = vmatprep.subr.bf16.mxu0 %v2446_v50 }
 0x31f   :  { %v575_v25 = vpop.f32.mrb[16].mxu0 }
 0x320   :  { %v2569_v44 = vpop.f32.mrb[17].mxu0 }
 0x321   :  { %v579_v45 = vpop.f32.mrb[18].mxu0 }
 0x322   :  { %v580_v46 = vpop.f32.mrb[19].mxu0  ;;  %v333_v45 = vld [vmem:[#allocation3 + $0x18] sm:$0xff] }
 0x32f   :  { %v653_v53 = vpop.f32.mrb[20].mxu0 }
 0x330   :  { %v660_v55 = vadd.f32 %v653_v53, %v610_v48  ;;  %v655_v58 = vpop.f32.mrb[21].mxu0 }
 0x331   :  { %v661_v59 = vadd.f32 %v655_v58, %v611_v54  ;;  %v657_v62 = vpop.f32.mrb[22].mxu0 }
 0x332   :  { %v1798_v5 = vmul.f32 -1.442695, %v660_v55  ;;  %v658_v11 = vpop.f32.mrb[23].mxu0  ;;  %v755_v55 = vunpack.c.l.bf16 %v2528_v47 }
 0x333   :  { %v1799_v33 = vmul.f32 -1.442695, %v661_v59 }
 0x334   :  { %1918 = vpow2.f32 %v1798_v5 }
 0x335   :  { %1920 = vtanh.f32 %v661_v59  ;;  %v756_v59 = vunpack.c.h.bf16 %v2528_v47 }
 0x33e   :  { %v1919_v22 = vpop.eup %1918 }
 0x33f   :  { %v665_v26 = vadd.f32 1.0, %v1919_v22  ;;  %v1921_v27 = vpop.eup %1920 }
 0x341   :  { %1922 = vrcp.f32 %v665_v26 }
 0x342   :  { %1924 = vpow2.f32 %v1799_v33 }
 0x34b   :  { %v1923_v28 = vpop.eup %1922 }
 0x34c   :  { %v676_v29 = vmul.f32 %v1923_v28, %v1921_v27  ;;  %v1925_v34 = vpop.eup %1924  ;;  %v675_v37 = vmul.f32 %v1923_v28, %v2510_v30  ;;  %v121_v30 = vld [vmem:[%s2925_s5] sm:$0x3] }
 0x34d   :  { %v672_v35 = vadd.f32 1.0, %v1925_v34  ;;  %v2603_v48 = vrot.slane %v121_v30, %v2420_v21 }
 0x34e   :  { %678 = vrot.lane.b32.xlu0 %v676_v29, %s2252_s4  ;;  %v2610_v29 = vrot.slane %v121_v30, %v129_v23 }
 0x34f   :  { %1926 = vrcp.f32 %v672_v35  ;;  %v576_v53 = vadd.f32 %v575_v25, %v2603_v48 }
 0x350   :  { %v578_v47 = vadd.f32 %v2569_v44, %v2610_v29 }
 0x351   :  { %v1795_v54 = vmul.f32 -1.442695, %v576_v53 }
 0x359   :  { %v1927_v41 = vpop.eup %1926 }
 0x3c0   :  { %v679_v39 = vpop.permute.xlu0 %678 }
 0x3c1   :  { %v2575_v40 = vadd.f32 %v679_v39, %v675_v37 }
 0x3c3   :  { %1928 = vtanh.f32 %v2575_v40 }
 0x3c4   :  { %1930 = vpow2.f32 %v1795_v54 }
 0x3cd   :  { %v1929_v42 = vpop.eup %1928 }
 0x3ce   :  { %v683_v43 = vmul.f32 %v1929_v42, %v1927_v41  ;;  %v1931_v28 = vpop.eup %1930 }
 0x3cf   :  { %v585_v33 = vadd.f32 1.0, %v1931_v28 }
 0x3d0   :  { %v757_v24 = vpack.c.bf16 %v683_v43, %v683_v43 }
 0x3d2   :  { %759 = vrot.lane.b32.xlu1 %v757_v24, %s2252_s4 }
 0x3d6   :  { %596 = vrot.lane.b32.xlu1 %v333_v45, %s2252_s4 }
 0x3da   :  { %685 = vrot.lane.b32.xlu1 %v683_v43, %s2252_s4  ;;  %v1796_v43 = vmul.f32 -1.442695, %v578_v47 }
 0x444   :  { %v760_v46 = vpop.permute.xlu1 %759 }
 0x445   :  { %1802 = vmatmul.mubr.msk.bf16.vlgmr.msra.gmra.mrb[24].mxu0 %vm92_vm0, %v760_v46 }
 0x446   :  { %836 = vmatpush1.bf16.msra.mxu0 %v2448_v51  ;;  %867 = vmatprep.mubr.bf16.mxu0 %v2250_v1 }
 0x447   :  { %837 = vmatprep.subr.bf16.mxu0 %v2450_v52 }
 0x448   :  { %v597_v30 = vpop.permute.xlu1 %596 }
 0x44a   :  { %838 = vmatpush1.bf16.msra.mxu0 %v2455_v56 }
 0x44b   :  { %839 = vmatprep.subr.bf16.mxu0 %v2460_v57 }
 0x44e   :  { %840 = vmatpush1.bf16.msra.mxu0 %v2465_v60 }
 0x44f   :  { %841 = vmatprep.subr.bf16.mxu0 %v2469_v61 }
 0x452   :  { %842 = vmatpush1.bf16.msra.mxu0 %v2473_v63 }
 0x453   :  { %843 = vmatprep.subr.bf16.mxu0 %v2478_v0 }
 0x456   :  { %844 = vmatpush1.bf16.msra.mxu0 %v2483_v9 }
 0x457   :  { %845 = vmatprep.subr.bf16.mxu0 %v2487_v10 }
 0x45a   :  { %846 = vmatpush1.bf16.msra.mxu0 %v2491_v14 }
 0x45b   :  { %847 = vmatprep.subr.bf16.mxu0 %v2496_v17 }
 0x45e   :  { %848 = vmatpush1.bf16.msra.mxu0 %v2501_v18 }
 0x45f   :  { %849 = vmatprep.subr.bf16.mxu0 %v2513_v31 }
 0x462   :  { %850 = vmatpush1.bf16.msra.mxu0 %v2515_v32 }
 0x463   :  { %1054 = vmatprep.subr.bf16.mxu0 %v2388_v3 }
 0x518   :  { %v798_v58 = vpop.f32.mrb[24].mxu0 }
 0x519   :  { %v805_v62 = vadd.f32 %v798_v58, %v755_v55  ;;  %v800_v5 = vpop.f32.mrb[25].mxu0 }
 0x51a   :  { %v806_v11 = vadd.f32 %v800_v5, %v756_v59  ;;  %v802_v22 = vpop.f32.mrb[26].mxu0 }
 0x51b   :  { %v1803_v26 = vmul.f32 -1.442695, %v805_v62  ;;  %v803_v27 = vpop.f32.mrb[27].mxu0 }
 0x51c   :  { %v1804_v23 = vmul.f32 -1.442695, %v806_v11 }
 0x51d   :  { %1932 = vpow2.f32 %v1803_v26 }
 0x51e   :  { %1934 = vtanh.f32 %v806_v11 }
 0x527   :  { %v1933_v25 = vpop.eup %1932 }
 0x528   :  { %v810_v34 = vadd.f32 1.0, %v1933_v25  ;;  %v1935_v35 = vpop.eup %1934  ;;  %v686_v25 = vpop.permute.xlu1 %685 }
 0x52a   :  { %1936 = vrcp.f32 %v810_v34 }
 0x52b   :  { %1938 = vrcp.f32 %v585_v33 }
 0x52c   :  { %1940 = vtanh.f32 %v578_v47 }
 0x52d   :  { %1942 = vpow2.f32 %v1804_v23 }
 0x52e   :  { %1944 = vpow2.f32 %v1796_v43 }
 0x534   :  { %v1937_v37 = vpop.eup %1936 }
 0x535   :  { %v821_v39 = vmul.f32 %v1937_v37, %v1935_v35  ;;  %v1939_v41 = vpop.eup %1938  ;;  %v820_v46 = vmul.f32 %v1937_v37, %v2575_v40 }
 0x536   :  { %v1941_v42 = vpop.eup %1940  ;;  %v599_v58 = vmul.f32 %v1939_v41, %v597_v30  ;;  %v900_v30 = vunpack.c.l.bf16 %v2531_v49 }
 0x537   :  { %823 = vrot.lane.b32.xlu0 %v821_v39, %s2252_s4  ;;  %v600_v20 = vmul.f32 %v1941_v42, %v1939_v41  ;;  %v1943_v24 = vpop.eup %1942 }
 0x538   :  { %v817_v45 = vadd.f32 1.0, %v1943_v24  ;;  %v1945_v44 = vpop.eup %1944 }
 0x539   :  { %v592_v55 = vadd.f32 1.0, %v1945_v44 }
 0x53a   :  { %1946 = vrcp.f32 %v817_v45 }
 0x53b   :  { %602 = vrot.lane.b32.xlu0 %v600_v20, %s2252_s4 }
 0x544   :  { %v1947_v5 = vpop.eup %1946 }
 0x5a9   :  { %v824_v53 = vpop.permute.xlu0 %823 }
 0x5aa   :  { %v2617_v54 = vadd.f32 %v824_v53, %v820_v46 }
 0x5ac   :  { %1948 = vtanh.f32 %v2617_v54 }
 0x5ad   :  { %v603_v59 = vpop.permute.xlu0 %602  ;;  %1950 = vrcp.f32 %v592_v55  ;;  %v901_v55 = vunpack.c.h.bf16 %v2531_v49 }
 0x5ae   :  { %v2620_v62 = vadd.f32 %v603_v59, %v599_v58 }
 0x5b0   :  { %1952 = vtanh.f32 %v2620_v62 }
 0x5b6   :  { %v1949_v11 = vpop.eup %1948 }
 0x5b7   :  { %v828_v22 = vmul.f32 %v1949_v11, %v1947_v5  ;;  %v1951_v26 = vpop.eup %1950 }
 0x5b9   :  { %v902_v40 = vpack.c.bf16 %v828_v22, %v828_v22 }
 0x5ba   :  { %v1953_v27 = vpop.eup %1952 }
 0x5bb   :  { %904 = vrot.lane.b32.xlu0 %v902_v40, %s2252_s4  ;;  %v607_v28 = vmul.f32 %v1953_v27, %v1951_v26 }
 0x5bd   :  { %v688_v33 = vsel %vm92_vm0, %v686_v25, %v607_v28 }
 0x5be   :  { %v689_v34 = vpack.c.bf16 %v688_v33, %v688_v33 }
 0x5bf   :  { %830 = vrot.lane.b32.xlu0 %v828_v22, %s2252_s4 }
 0x5c0   :  { %723 = vmatmul.mubr.bf16.vlgmr.msra.gmra.mrb[4].mxu1 %v689_v34 }
 0x5c1   :  { %910 = vmatpush1.bf16.msra.mxu1 %v2390_v4  ;;  %941 = vmatprep.mubr.bf16.mxu1 %v2250_v1 }
 0x5c2   :  { %911 = vmatprep.subr.bf16.mxu1 %v2394_v7 }
 0x5c5   :  { %912 = vmatpush1.bf16.msra.mxu1 %v2396_v8 }
 0x5c6   :  { %913 = vmatprep.subr.bf16.mxu1 %v2399_v12 }
 0x5c9   :  { %914 = vmatpush1.bf16.msra.mxu1 %v2402_v13 }
 0x5ca   :  { %915 = vmatprep.subr.bf16.mxu1 %v2406_v15 }
 0x5cd   :  { %916 = vmatpush1.bf16.msra.mxu1 %v2408_v16 }
 0x5ce   :  { %980 = vmatprep.subr.bf16.mxu1 %v2446_v50 }
 0x62d   :  { %v905_v47 = vpop.permute.xlu0 %904 }
 0x62e   :  { %1807 = vmatmul.mubr.msk.bf16.vlgmr.msra.gmra.mrb[8].mxu1 %vm92_vm0, %v905_v47 }
 0x62f   :  { %981 = vmatpush1.bf16.msra.mxu1 %v2448_v51  ;;  %1012 = vmatprep.mubr.bf16.mxu1 %v2250_v1 }
 0x630   :  { %982 = vmatprep.subr.bf16.mxu1 %v2450_v52 }
 0x633   :  { %983 = vmatpush1.bf16.msra.mxu1 %v2455_v56 }
 0x634   :  { %984 = vmatprep.subr.bf16.mxu1 %v2460_v57 }
 0x637   :  { %985 = vmatpush1.bf16.msra.mxu1 %v2465_v60 }
 0x638   :  { %986 = vmatprep.subr.bf16.mxu1 %v2469_v61 }
 0x63b   :  { %987 = vmatpush1.bf16.msra.mxu1 %v2473_v63 }
 0x63c   :  { %988 = vmatprep.subr.bf16.mxu1 %v2478_v0 }
 0x63f   :  { %989 = vmatpush1.bf16.msra.mxu1 %v2483_v9 }
 0x640   :  { %990 = vmatprep.subr.bf16.mxu1 %v2487_v10 }
 0x643   :  { %991 = vmatpush1.bf16.msra.mxu1 %v2491_v14 }
 0x644   :  { %992 = vmatprep.subr.bf16.mxu1 %v2496_v17 }
 0x647   :  { %993 = vmatpush1.bf16.msra.mxu1 %v2501_v18 }
 0x648   :  { %994 = vmatprep.subr.bf16.mxu1 %v2513_v31 }
 0x64b   :  { %995 = vmatpush1.bf16.msra.mxu1 %v2515_v32 }
 0x64c   :  { %1199 = vmatprep.subr.bf16.mxu1 %v2388_v3 }
 0x693   :  { %v724_v35 = vpop.f32.mrb[4].mxu1 }
 0x694   :  { %v725_v37 = vadd.f32 %v724_v35, %v2603_v48  ;;  %v726_v39 = vpop.f32.mrb[5].mxu1 }
 0x695   :  { %v728_v41 = vpop.f32.mrb[6].mxu1  ;;  %v727_v23 = vadd.f32 %v726_v39, %v2610_v29 }
 0x696   :  { %v1800_v42 = vmul.f32 -1.442695, %v725_v37  ;;  %v729_v20 = vpop.f32.mrb[7].mxu1 }
 0x697   :  { %v1801_v27 = vmul.f32 -1.442695, %v727_v23 }
 0x698   :  { %1954 = vpow2.f32 %v1800_v42 }
 0x699   :  { %1956 = vtanh.f32 %v727_v23  ;;  %v831_v23 = vpop.permute.xlu0 %830 }
 0x6a2   :  { %v1955_v43 = vpop.eup %1954 }
 0x6a3   :  { %v734_v24 = vadd.f32 1.0, %v1955_v43  ;;  %v1957_v45 = vpop.eup %1956 }
 0x6a5   :  { %1958 = vrcp.f32 %v734_v24 }
 0x6af   :  { %v1959_v44 = vpop.eup %1958 }
 0x6b0   :  { %v745_v46 = vmul.f32 %v1959_v44, %v1957_v45  ;;  %v744_v35 = vmul.f32 %v1959_v44, %v2620_v62 }
 0x6b2   :  { %747 = vrot.lane.b32.xlu1 %v745_v46, %s2252_s4 }
 0x701   :  { %v943_v53 = vpop.f32.mrb[8].mxu1 }
 0x702   :  { %v950_v58 = vadd.f32 %v943_v53, %v900_v30  ;;  %v945_v59 = vpop.f32.mrb[9].mxu1 }
 0x703   :  { %v951_v5 = vadd.f32 %v945_v59, %v901_v55  ;;  %v947_v11 = vpop.f32.mrb[10].mxu1 }
 0x704   :  { %v1808_v22 = vmul.f32 -1.442695, %v950_v58  ;;  %v948_v26 = vpop.f32.mrb[11].mxu1 }
 0x705   :  { %v1809_v62 = vmul.f32 -1.442695, %v951_v5 }
 0x706   :  { %1960 = vpow2.f32 %v1808_v22 }
 0x707   :  { %1962 = vtanh.f32 %v951_v5 }
 0x710   :  { %v1961_v40 = vpop.eup %1960 }
 0x711   :  { %v955_v28 = vadd.f32 1.0, %v1961_v40  ;;  %v1963_v25 = vpop.eup %1962 }
 0x713   :  { %1964 = vrcp.f32 %v955_v28 }
 0x714   :  { %1966 = vpow2.f32 %v1801_v27 }
 0x71d   :  { %v1965_v33 = vpop.eup %1964 }
 0x71e   :  { %v966_v34 = vmul.f32 %v1965_v33, %v1963_v25  ;;  %v1967_v47 = vpop.eup %1966  ;;  %v965_v46 = vmul.f32 %v1965_v33, %v2617_v54 }
 0x71f   :  { %v741_v49 = vadd.f32 1.0, %v1967_v47 }
 0x720   :  { %968 = vrot.lane.b32.xlu1 %v966_v34, %s2252_s4 }
 0x721   :  { %1968 = vrcp.f32 %v741_v49 }
 0x724   :  { %v748_v37 = vpop.permute.xlu1 %747 }
 0x725   :  { %v2660_v39 = vadd.f32 %v748_v37, %v744_v35 }
 0x727   :  { %1970 = vtanh.f32 %v2660_v39 }
 0x728   :  { %1972 = vpow2.f32 %v1809_v62 }
 0x72b   :  { %v1969_v41 = vpop.eup %1968 }
 0x731   :  { %v1971_v42 = vpop.eup %1970 }
 0x732   :  { %v752_v20 = vmul.f32 %v1971_v42, %v1969_v41  ;;  %v1973_v45 = vpop.eup %1972 }
 0x733   :  { %v962_v44 = vadd.f32 1.0, %v1973_v45 }
 0x734   :  { %v833_v43 = vsel %vm92_vm0, %v831_v23, %v752_v20 }
 0x735   :  { %v834_v24 = vpack.c.bf16 %v833_v43, %v833_v43  ;;  %1974 = vrcp.f32 %v962_v44 }
 0x737   :  { %868 = vmatmul.mubr.bf16.vlgmr.msra.gmra.mrb[28].mxu0 %v834_v24 }
 0x738   :  { %1055 = vmatpush1.bf16.msra.mxu0 %v2390_v4  ;;  %1086 = vmatprep.mubr.bf16.mxu0 %v2250_v1 }
 0x739   :  { %1056 = vmatprep.subr.bf16.mxu0 %v2394_v7 }
 0x73c   :  { %1057 = vmatpush1.bf16.msra.mxu0 %v2396_v8 }
 0x73d   :  { %1058 = vmatprep.subr.bf16.mxu0 %v2399_v12 }
 0x73f   :  { %v1975_v55 = vpop.eup %1974 }
 0x740   :  { %1059 = vmatpush1.bf16.msra.mxu0 %v2402_v13 }
 0x741   :  { %1060 = vmatprep.subr.bf16.mxu0 %v2406_v15 }
 0x744   :  { %1061 = vmatpush1.bf16.msra.mxu0 %v2408_v16 }
 0x745   :  { %1125 = vmatprep.subr.bf16.mxu0 %v2446_v50 }
 0x792   :  { %v969_v30 = vpop.permute.xlu1 %968 }
 0x793   :  { %v2674_v53 = vadd.f32 %v969_v30, %v965_v46 }
 0x795   :  { %1976 = vtanh.f32 %v2674_v53 }
 0x79f   :  { %v1977_v58 = vpop.eup %1976 }
 0x7a0   :  { %v973_v59 = vmul.f32 %v1977_v58, %v1975_v55 }
 0x7a2   :  { %v1047_v11 = vpack.c.bf16 %v973_v59, %v973_v59 }
 0x7a4   :  { %1049 = vrot.lane.b32.xlu0 %v1047_v11, %s2252_s4 }
 0x7a8   :  { %975 = vrot.lane.b32.xlu0 %v973_v59, %s2252_s4 }
 0x80a   :  { %v869_v5 = vpop.f32.mrb[28].mxu0 }
 0x80b   :  { %v870_v22 = vadd.f32 %v869_v5, %v2603_v48  ;;  %v871_v26 = vpop.f32.mrb[29].mxu0 }
 0x80c   :  { %v873_v40 = vpop.f32.mrb[30].mxu0  ;;  %v872_v25 = vadd.f32 %v871_v26, %v2610_v29 }
 0x80d   :  { %v1805_v54 = vmul.f32 -1.442695, %v870_v22  ;;  %v874_v27 = vpop.f32.mrb[31].mxu0 }
 0x80e   :  { %v1806_v37 = vmul.f32 -1.442695, %v872_v25 }
 0x80f   :  { %1978 = vpow2.f32 %v1805_v54 }
 0x810   :  { %1980 = vtanh.f32 %v872_v25 }
 0x816   :  { %v1050_v28 = vpop.permute.xlu0 %1049 }
 0x817   :  { %1812 = vmatmul.mubr.msk.bf16.vlgmr.msra.gmra.mrb[32].mxu0 %vm92_vm0, %v1050_v28 }
 0x818   :  { %1126 = vmatpush1.bf16.msra.mxu0 %v2448_v51  ;;  %1157 = vmatprep.mubr.bf16.mxu0 %v2250_v1 }
 0x819   :  { %v1979_v33 = vpop.eup %1978  ;;  %1127 = vmatprep.subr.bf16.mxu0 %v2450_v52 }
 0x81a   :  { %v879_v34 = vadd.f32 1.0, %v1979_v33  ;;  %v1981_v47 = vpop.eup %1980  ;;  %v976_v44 = vpop.permute.xlu0 %975 }
 0x81c   :  { %1982 = vrcp.f32 %v879_v34  ;;  %1128 = vmatpush1.bf16.msra.mxu0 %v2455_v56 }
 0x81d   :  { %1129 = vmatprep.subr.bf16.mxu0 %v2460_v57  ;;  %1984 = vpow2.f32 %v1806_v37 }
 0x820   :  { %1130 = vmatpush1.bf16.msra.mxu0 %v2465_v60 }
 0x821   :  { %1131 = vmatprep.subr.bf16.mxu0 %v2469_v61 }
 0x824   :  { %1132 = vmatpush1.bf16.msra.mxu0 %v2473_v63 }
 0x825   :  { %1133 = vmatprep.subr.bf16.mxu0 %v2478_v0 }
 0x826   :  { %v1983_v49 = vpop.eup %1982 }
 0x827   :  { %v890_v35 = vmul.f32 %v1983_v49, %v1981_v47  ;;  %v1985_v41 = vpop.eup %1984  ;;  %v889_v20 = vmul.f32 %v1983_v49, %v2660_v39 }
 0x828   :  { %1134 = vmatpush1.bf16.msra.mxu0 %v2483_v9  ;;  %v886_v42 = vadd.f32 1.0, %v1985_v41 }
 0x829   :  { %892 = vrot.lane.b32.xlu1 %v890_v35, %s2252_s4  ;;  %1135 = vmatprep.subr.bf16.mxu0 %v2487_v10 }
 0x82a   :  { %1986 = vrcp.f32 %v886_v42 }
 0x82c   :  { %1136 = vmatpush1.bf16.msra.mxu0 %v2491_v14 }
 0x82d   :  { %1137 = vmatprep.subr.bf16.mxu0 %v2496_v17 }
 0x830   :  { %1138 = vmatpush1.bf16.msra.mxu0 %v2501_v18 }
 0x831   :  { %1139 = vmatprep.subr.bf16.mxu0 %v2513_v31 }
 0x834   :  { %1140 = vmatpush1.bf16.msra.mxu0 %v2515_v32  ;;  %v1987_v24 = vpop.eup %1986 }
 0x835   :  { %1344 = vmatprep.subr.bf16.mxu0 %v2388_v3  ;;  %v1045_v3 = vunpack.c.l.bf16 %v2536_v6 }
 0x89b   :  { %v893_v23 = vpop.permute.xlu1 %892 }
 0x89c   :  { %v2701_v43 = vadd.f32 %v893_v23, %v889_v20 }
 0x89e   :  { %1988 = vtanh.f32 %v2701_v43 }
 0x8a8   :  { %v1989_v62 = vpop.eup %1988 }
 0x8a9   :  { %v897_v45 = vmul.f32 %v1989_v62, %v1987_v24 }
 0x8ab   :  { %v978_v46 = vsel %vm92_vm0, %v976_v44, %v897_v45 }
 0x8ac   :  { %v979_v30 = vpack.c.bf16 %v978_v46, %v978_v46 }
 0x8ae   :  { %1013 = vmatmul.mubr.bf16.vlgmr.msra.gmra.mrb[12].mxu1 %v979_v30 }
 0x8af   :  { %1200 = vmatpush1.bf16.msra.mxu1 %v2390_v4  ;;  %1231 = vmatprep.mubr.bf16.mxu1 %v2250_v1  ;;  %v1046_v4 = vunpack.c.h.bf16 %v2536_v6 }
 0x8b0   :  { %1201 = vmatprep.subr.bf16.mxu1 %v2394_v7 }
 0x8b3   :  { %1202 = vmatpush1.bf16.msra.mxu1 %v2396_v8 }
 0x8b4   :  { %1203 = vmatprep.subr.bf16.mxu1 %v2399_v12 }
 0x8b7   :  { %1204 = vmatpush1.bf16.msra.mxu1 %v2402_v13 }
 0x8b8   :  { %1205 = vmatprep.subr.bf16.mxu1 %v2406_v15 }
 0x8bb   :  { %1206 = vmatpush1.bf16.msra.mxu1 %v2408_v16 }
 0x8bc   :  { %1270 = vmatprep.subr.bf16.mxu1 %v2446_v50 }
 0x8ea   :  { %v1088_v39 = vpop.f32.mrb[32].mxu0 }
 0x8eb   :  { %v1095_v55 = vadd.f32 %v1088_v39, %v1045_v3  ;;  %v1090_v58 = vpop.f32.mrb[33].mxu0  ;;  %v2767_v3 = vld [vmem:[#allocation10 + $0x30] ss:$8 sps:$4 sm:$0xff]   ;;  %v2770_v39 = vld [vmem:[#allocation11 + $0x4] ss:$8 sps:$4 sm:$0xff]  }
 0x8ec   :  { %v1096_v7 = vadd.f32 %v1090_v58, %v1046_v4  ;;  %v1092_v59 = vpop.f32.mrb[34].mxu0  ;;  %v1190_v4 = vunpack.c.l.bf16 %v2539_v19  ;;  %v1191_v58 = vunpack.c.h.bf16 %v2539_v19 }
 0x8ed   :  { %v1813_v8 = vmul.f32 -1.442695, %v1095_v55  ;;  %v1093_v11 = vpop.f32.mrb[35].mxu0 }
 0x8ee   :  { %v1814_v50 = vmul.f32 -1.442695, %v1096_v7 }
 0x8ef   :  { %1990 = vpow2.f32 %v1813_v8 }
 0x8f0   :  { %1992 = vtanh.f32 %v1096_v7 }
 0x8f9   :  { %v1991_v12 = vpop.eup %1990 }
 0x8fa   :  { %v1100_v13 = vadd.f32 1.0, %v1991_v12  ;;  %v1993_v15 = vpop.eup %1992 }
 0x8fc   :  { %1994 = vrcp.f32 %v1100_v13 }
 0x8fd   :  { %1996 = vpow2.f32 %v1814_v50 }
 0x906   :  { %v1995_v16 = vpop.eup %1994 }
 0x907   :  { %v1111_v5 = vmul.f32 %v1995_v16, %v1993_v15  ;;  %v1997_v22 = vpop.eup %1996  ;;  %v1110_v26 = vmul.f32 %v1995_v16, %v2674_v53 }
 0x908   :  { %v1107_v6 = vadd.f32 1.0, %v1997_v22 }
 0x909   :  { %1113 = vrot.lane.b32.xlu1 %v1111_v5, %s2252_s4 }
 0x90a   :  { %1998 = vrcp.f32 %v1107_v6 }
 0x914   :  { %v1999_v49 = vpop.eup %1998 }
 0x97b   :  { %v1114_v40 = vpop.permute.xlu1 %1113 }
 0x97c   :  { %v2718_v54 = vadd.f32 %v1114_v40, %v1110_v26 }
 0x97e   :  { %2000 = vtanh.f32 %v2718_v54 }
 0x981   :  { %v1014_v27 = vpop.f32.mrb[12].mxu1 }
 0x982   :  { %v1015_v28 = vadd.f32 %v1014_v27, %v2603_v48  ;;  %v1016_v25 = vpop.f32.mrb[13].mxu1 }
 0x983   :  { %v1018_v33 = vpop.f32.mrb[14].mxu1  ;;  %v1017_v53 = vadd.f32 %v1016_v25, %v2610_v29 }
 0x984   :  { %v1810_v34 = vmul.f32 -1.442695, %v1015_v28  ;;  %v1019_v47 = vpop.f32.mrb[15].mxu1 }
 0x985   :  { %v1811_v45 = vmul.f32 -1.442695, %v1017_v53 }
 0x986   :  { %2002 = vpow2.f32 %v1810_v34 }
 0x987   :  { %2004 = vtanh.f32 %v1017_v53 }
 0x988   :  { %v2001_v35 = vpop.eup %2000 }
 0x989   :  { %v1118_v37 = vmul.f32 %v2001_v35, %v1999_v49 }
 0x98b   :  { %v1192_v41 = vpack.c.bf16 %v1118_v37, %v1118_v37 }
 0x98d   :  { %1194 = vrot.lane.b32.xlu0 %v1192_v41, %s2252_s4 }
 0x990   :  { %v2003_v42 = vpop.eup %2002 }
 0x991   :  { %v1024_v20 = vadd.f32 1.0, %v2003_v42  ;;  %1120 = vrot.lane.b32.xlu0 %v1118_v37, %s2252_s4  ;;  %v2005_v23 = vpop.eup %2004 }
 0x993   :  { %2006 = vrcp.f32 %v1024_v20 }
 0x994   :  { %2008 = vpow2.f32 %v1811_v45 }
 0x99d   :  { %v2007_v24 = vpop.eup %2006 }
 0x99e   :  { %v1035_v62 = vmul.f32 %v2007_v24, %v2005_v23  ;;  %v2009_v46 = vpop.eup %2008 }
 0x99f   :  { %v1031_v30 = vadd.f32 1.0, %v2009_v46 }
 0x9a0   :  { %1037 = vrot.lane.b32.xlu1 %v1035_v62, %s2252_s4 }
 0x9a1   :  { %2010 = vrcp.f32 %v1031_v30 }
 0x9ff   :  { %v1195_v44 = vpop.permute.xlu0 %1194 }
 0xa00   :  { %1817 = vmatmul.mubr.msk.bf16.vlgmr.msra.gmra.mrb[16].mxu1 %vm92_vm0, %v1195_v44 }
 0xa01   :  { %1271 = vmatpush1.bf16.msra.mxu1 %v2448_v51  ;;  %1302 = vmatprep.mubr.bf16.mxu1 %v2250_v1  ;;  %v1034_v51 = vmul.f32 %v2007_v24, %v2701_v43  ;;  %v2748_v43 = vld [vmem:[#allocation10] ss:$8 sps:$4 sm:$0xff]  }
 0xa02   :  { %1272 = vmatprep.subr.bf16.mxu1 %v2450_v52 }
 0xa05   :  { %1273 = vmatpush1.bf16.msra.mxu1 %v2455_v56 }
 0xa06   :  { %1274 = vmatprep.subr.bf16.mxu1 %v2460_v57  ;;  %v2011_v57 = vpop.eup %2010 }
 0xa09   :  { %1275 = vmatpush1.bf16.msra.mxu1 %v2465_v60  ;;  %v2102_v60 = vld [vmem:[#allocation10 + $0x4] ss:$8 sps:$4 sm:$0xff]  }
 0xa0a   :  { %1276 = vmatprep.subr.bf16.mxu1 %v2469_v61 }
 0xa0d   :  { %1277 = vmatpush1.bf16.msra.mxu1 %v2473_v63 }
 0xa0e   :  { %1278 = vmatprep.subr.bf16.mxu1 %v2478_v0  ;;  %v1121_v0 = vpop.permute.xlu0 %1120 }
 0xa11   :  { %1279 = vmatpush1.bf16.msra.mxu1 %v2483_v9 }
 0xa12   :  { %v1038_v52 = vpop.permute.xlu1 %1037  ;;  %1280 = vmatprep.subr.bf16.mxu1 %v2487_v10 }
 0xa13   :  { %v2739_v56 = vadd.f32 %v1038_v52, %v1034_v51 }
 0xa15   :  { %2012 = vtanh.f32 %v2739_v56  ;;  %1281 = vmatpush1.bf16.msra.mxu1 %v2491_v14  ;;  %v2752_v14 = vld [vmem:[#allocation10 + $0x14] ss:$8 sps:$4 sm:$0xff]  }
 0xa16   :  { %1282 = vmatprep.subr.bf16.mxu1 %v2496_v17  ;;  %v2755_v17 = vld [vmem:[#allocation10 + $0x10] ss:$8 sps:$4 sm:$0xff]  }
 0xa19   :  { %1283 = vmatpush1.bf16.msra.mxu1 %v2501_v18  ;;  %v2758_v18 = vld [vmem:[#allocation10 + $0x24] ss:$8 sps:$4 sm:$0xff]  }
 0xa1a   :  { %1284 = vmatprep.subr.bf16.mxu1 %v2513_v31  ;;  %v2761_v31 = vld [vmem:[#allocation10 + $0x20] ss:$8 sps:$4 sm:$0xff]  }
 0xa1d   :  { %1285 = vmatpush1.bf16.msra.mxu1 %v2515_v32  ;;  %v2764_v32 = vld [vmem:[#allocation10 + $0x34] ss:$8 sps:$4 sm:$0xff]  }
 0xa1e   :  { %1489 = vmatprep.subr.bf16.mxu1 %v2102_v60 }
 0xa1f   :  { %v2013_v61 = vpop.eup %2012 }
 0xa20   :  { %v1042_v63 = vmul.f32 %v2013_v61, %v2011_v57 }
 0xa22   :  { %v1123_v9 = vsel %vm92_vm0, %v1121_v0, %v1042_v63  ;;  %v2790_v0 = vld [vmem:[#allocation11] ss:$8 sps:$4 sm:$0xff]  }
 0xa23   :  { %v1124_v10 = vpack.c.bf16 %v1123_v9, %v1123_v9 }
 0xa25   :  { %1158 = vmatmul.mubr.bf16.vlgmr.msra.gmra.mrb[36].mxu0 %v1124_v10 }
 0xa26   :  { %1345 = vmatpush1.bf16.msra.mxu0 %v2748_v43  ;;  %1376 = vmatprep.mubr.bf16.mxu0 %v2250_v1 }
 0xa27   :  { %1346 = vmatprep.subr.bf16.mxu0 %v2752_v14 }
 0xa2a   :  { %1347 = vmatpush1.bf16.msra.mxu0 %v2755_v17 }
 0xa2b   :  { %1348 = vmatprep.subr.bf16.mxu0 %v2758_v18 }
 0xa2e   :  { %1349 = vmatpush1.bf16.msra.mxu0 %v2761_v31 }
 0xa2f   :  { %1350 = vmatprep.subr.bf16.mxu0 %v2764_v32 }
 0xa32   :  { %1351 = vmatpush1.bf16.msra.mxu0 %v2767_v3 }
 0xa33   :  { %1415 = vmatprep.subr.bf16.mxu0 %v2770_v39 }
 0xad3   :  { %v1233_v55 = vpop.f32.mrb[16].mxu1 }
 0xad4   :  { %v1240_v7 = vadd.f32 %v1233_v55, %v1190_v4  ;;  %v1235_v59 = vpop.f32.mrb[17].mxu1 }
 0xad5   :  { %v1241_v8 = vadd.f32 %v1235_v59, %v1191_v58  ;;  %v1237_v11 = vpop.f32.mrb[18].mxu1  ;;  %v2798_v58 = vld [vmem:[#allocation11 + $0x10] ss:$8 sps:$4 sm:$0xff]   ;;  %v2806_v59 = vld [vmem:[#allocation11 + $0x20] ss:$8 sps:$4 sm:$0xff]  }
 0xad6   :  { %v1818_v12 = vmul.f32 -1.442695, %v1240_v7  ;;  %v1238_v13 = vpop.f32.mrb[19].mxu1  ;;  %v2801_v7 = vld [vmem:[#allocation11 + $0x24] ss:$8 sps:$4 sm:$0xff]  }
 0xad7   :  { %v1819_v37 = vmul.f32 -1.442695, %v1241_v8  ;;  %v2814_v11 = vld [vmem:[#allocation11 + $0x30] ss:$8 sps:$4 sm:$0xff]  }
 0xad8   :  { %2014 = vpow2.f32 %v1818_v12  ;;  %v2822_v12 = vld [vmem:[#allocation11 + $0x40] ss:$8 sps:$4 sm:$0xff]   ;;  %v2843_v13 = vld [vmem:[#allocation11 + $0x70] ss:$8 sps:$4 sm:$0xff]  }
 0xad9   :  { %2016 = vtanh.f32 %v1241_v8  ;;  %v2810_v8 = vld [vmem:[#allocation11 + $0x34] ss:$8 sps:$4 sm:$0xff]  }
 0xae2   :  { %v2015_v15 = vpop.eup %2014 }
 0xae3   :  { %v1245_v16 = vadd.f32 1.0, %v2015_v15  ;;  %v2017_v5 = vpop.eup %2016 }
 0xae5   :  { %2018 = vrcp.f32 %v1245_v16 }
 0xaef   :  { %v2019_v50 = vpop.eup %2018 }
 0xaf0   :  { %v1256_v22 = vmul.f32 %v2019_v50, %v2017_v5  ;;  %v1255_v42 = vmul.f32 %v2019_v50, %v2718_v54 }
 0xaf2   :  { %1258 = vrot.lane.b32.xlu1 %v1256_v22, %s2252_s4 }
 0xaf8   :  { %v1159_v6 = vpop.f32.mrb[36].mxu0 }
 0xaf9   :  { %v1160_v26 = vadd.f32 %v1159_v6, %v2603_v48  ;;  %v1161_v19 = vpop.f32.mrb[37].mxu0 }
 0xafa   :  { %v1163_v40 = vpop.f32.mrb[38].mxu0  ;;  %v1162_v25 = vadd.f32 %v1161_v19, %v2610_v29 }
 0xafb   :  { %v1815_v27 = vmul.f32 -1.442695, %v1160_v26  ;;  %v1164_v28 = vpop.f32.mrb[39].mxu0 }
 0xafc   :  { %v1816_v46 = vmul.f32 -1.442695, %v1162_v25 }
 0xafd   :  { %2020 = vpow2.f32 %v1815_v27 }
 0xafe   :  { %2022 = vtanh.f32 %v1162_v25 }
 0xb07   :  { %v2021_v33 = vpop.eup %2020 }
 0xb08   :  { %v1169_v34 = vadd.f32 1.0, %v2021_v33  ;;  %v2023_v47 = vpop.eup %2022 }
 0xb0a   :  { %2024 = vrcp.f32 %v1169_v34 }
 0xb0b   :  { %2026 = vpow2.f32 %v1819_v37 }
 0xb14   :  { %v2025_v49 = vpop.eup %2024 }
 0xb15   :  { %v1180_v35 = vmul.f32 %v2025_v49, %v2023_v47  ;;  %v2027_v41 = vpop.eup %2026  ;;  %v1179_v51 = vmul.f32 %v2025_v49, %v2739_v56  ;;  %v2794_v56 = vld [vmem:[#allocation11 + $0x14] ss:$8 sps:$4 sm:$0xff]  }
 0xb16   :  { %v1252_v53 = vadd.f32 1.0, %v2027_v41 }
 0xb17   :  { %1182 = vrot.lane.b32.xlu1 %v1180_v35, %s2252_s4 }
 0xb18   :  { %2028 = vrcp.f32 %v1252_v53 }
 0xb22   :  { %v2029_v24 = vpop.eup %2028 }
 0xb64   :  { %v1259_v20 = vpop.permute.xlu1 %1258 }
 0xb65   :  { %v2780_v23 = vadd.f32 %v1259_v20, %v1255_v42 }
 0xb67   :  { %2030 = vtanh.f32 %v2780_v23 }
 0xb68   :  { %2032 = vpow2.f32 %v1816_v46 }
 0xb71   :  { %v2031_v62 = vpop.eup %2030 }
 0xb72   :  { %v1263_v45 = vmul.f32 %v2031_v62, %v2029_v24  ;;  %v2033_v54 = vpop.eup %2032 }
 0xb73   :  { %v1176_v57 = vadd.f32 1.0, %v2033_v54 }
 0xb74   :  { %v1337_v44 = vpack.c.bf16 %v1263_v45, %v1263_v45 }
 0xb76   :  { %1339 = vrot.lane.b32.xlu0 %v1337_v44, %s2252_s4 }
 0xb7a   :  { %1265 = vrot.lane.b32.xlu0 %v1263_v45, %s2252_s4 }
 0xb89   :  { %v1183_v30 = vpop.permute.xlu1 %1182 }
 0xb8a   :  { %v2786_v52 = vadd.f32 %v1183_v30, %v1179_v51 }
 0xb8c   :  { %2034 = vtanh.f32 %v2786_v52 }
 0xb8d   :  { %2036 = vrcp.f32 %v1176_v57 }
 0xb96   :  { %v2035_v60 = vpop.eup %2034 }
 0xb97   :  { %v2037_v63 = vpop.eup %2036 }
 0xb98   :  { %v1187_v9 = vmul.f32 %v2037_v63, %v2035_v60 }
 0xbe8   :  { %v1340_v61 = vpop.permute.xlu0 %1339 }
 0xbe9   :  { %1822 = vmatmul.mubr.msk.bf16.vlgmr.msra.gmra.mrb[40].mxu0 %vm92_vm0, %v1340_v61 }
 0xbea   :  { %1416 = vmatpush1.bf16.msra.mxu0 %v2790_v0  ;;  %1447 = vmatprep.mubr.bf16.mxu0 %v2250_v1 }
 0xbeb   :  { %1417 = vmatprep.subr.bf16.mxu0 %v2794_v56 }
 0xbec   :  { %v1266_v10 = vpop.permute.xlu0 %1265 }
 0xbed   :  { %v1268_v4 = vsel %vm92_vm0, %v1266_v10, %v1187_v9 }
 0xbee   :  { %v1269_v55 = vpack.c.bf16 %v1268_v4, %v1268_v4  ;;  %1418 = vmatpush1.bf16.msra.mxu0 %v2798_v58 }
 0xbef   :  { %1419 = vmatprep.subr.bf16.mxu0 %v2801_v7 }
 0xbf0   :  { %1303 = vmatmul.mubr.bf16.vlgmr.msra.gmra.mrb[20].mxu1 %v1269_v55 }
 0xbf1   :  { %1490 = vmatpush1.bf16.msra.mxu1 %v2748_v43  ;;  %1521 = vmatprep.mubr.bf16.mxu1 %v2250_v1  ;;  %v2818_v43 = vld [vmem:[#allocation11 + $0x44] ss:$8 sps:$4 sm:$0xff]  }
 0xbf2   :  { %1420 = vmatpush1.bf16.msra.mxu0 %v2806_v59  ;;  %1491 = vmatprep.subr.bf16.mxu1 %v2752_v14  ;;  %v2826_v14 = vld [vmem:[#allocation11 + $0x54] ss:$8 sps:$4 sm:$0xff]  }
 0xbf3   :  { %1421 = vmatprep.subr.bf16.mxu0 %v2810_v8 }
 0xbf5   :  { %1492 = vmatpush1.bf16.msra.mxu1 %v2755_v17  ;;  %v2830_v17 = vld [vmem:[#allocation11 + $0x50] ss:$8 sps:$4 sm:$0xff]  }
 0xbf6   :  { %1422 = vmatpush1.bf16.msra.mxu0 %v2814_v11  ;;  %1493 = vmatprep.subr.bf16.mxu1 %v2758_v18  ;;  %v2834_v18 = vld [vmem:[#allocation11 + $0x64] ss:$8 sps:$4 sm:$0xff]  }
 0xbf7   :  { %1423 = vmatprep.subr.bf16.mxu0 %v2818_v43 }
 0xbf9   :  { %1494 = vmatpush1.bf16.msra.mxu1 %v2761_v31  ;;  %v2837_v31 = vld [vmem:[#allocation11 + $0x60] ss:$8 sps:$4 sm:$0xff]  }
 0xbfa   :  { %1424 = vmatpush1.bf16.msra.mxu0 %v2822_v12  ;;  %1495 = vmatprep.subr.bf16.mxu1 %v2764_v32  ;;  %v2840_v32 = vld [vmem:[#allocation11 + $0x74] ss:$8 sps:$4 sm:$0xff]  }
 0xbfb   :  { %1425 = vmatprep.subr.bf16.mxu0 %v2826_v14 }
 0xbfd   :  { %1496 = vmatpush1.bf16.msra.mxu1 %v2767_v3  ;;  %v1335_v3 = vunpack.c.l.bf16 %v2544_v36 }
 0xbfe   :  { %1426 = vmatpush1.bf16.msra.mxu0 %v2830_v17  ;;  %1560 = vmatprep.subr.bf16.mxu1 %v2770_v39  ;;  %v1336_v39 = vunpack.c.h.bf16 %v2544_v36 }
 0xbff   :  { %1427 = vmatprep.subr.bf16.mxu0 %v2834_v18 }
 0xc02   :  { %1428 = vmatpush1.bf16.msra.mxu0 %v2837_v31 }
 0xc03   :  { %1429 = vmatprep.subr.bf16.mxu0 %v2840_v32 }
 0xc06   :  { %1430 = vmatpush1.bf16.msra.mxu0 %v2843_v13 }
 0xcbc   :  { %v1378_v15 = vpop.f32.mrb[40].mxu0 }
 0xcbd   :  { %v1385_v16 = vadd.f32 %v1378_v15, %v1335_v3  ;;  %v1380_v5 = vpop.f32.mrb[41].mxu0 }
 0xcbe   :  { %v1386_v50 = vadd.f32 %v1380_v5, %v1336_v39  ;;  %v1382_v22 = vpop.f32.mrb[42].mxu0 }
 0xcbf   :  { %v1823_v6 = vmul.f32 -1.442695, %v1385_v16  ;;  %v1383_v26 = vpop.f32.mrb[43].mxu0 }
 0xcc0   :  { %v1824_v62 = vmul.f32 -1.442695, %v1386_v50 }
 0xcc1   :  { %2038 = vpow2.f32 %v1823_v6 }
 0xcc3   :  { %v1304_v19 = vpop.f32.mrb[20].mxu1 }
 0xcc4   :  { %v1305_v40 = vadd.f32 %v1304_v19, %v2603_v48  ;;  %v1306_v27 = vpop.f32.mrb[21].mxu1 }
 0xcc5   :  { %v1308_v28 = vpop.f32.mrb[22].mxu1  ;;  %v1307_v36 = vadd.f32 %v1306_v27, %v2610_v29 }
 0xcc6   :  { %v1820_v25 = vmul.f32 -1.442695, %v1305_v40  ;;  %v1309_v33 = vpop.f32.mrb[23].mxu1 }
 0xcc7   :  { %v1821_v63 = vmul.f32 -1.442695, %v1307_v36 }
 0xcc8   :  { %2040 = vpow2.f32 %v1820_v25 }
 0xcc9   :  { %2042 = vtanh.f32 %v1386_v50 }
 0xccb   :  { %v2039_v34 = vpop.eup %2038 }
 0xccc   :  { %v1390_v47 = vadd.f32 1.0, %v2039_v34 }
 0xcce   :  { %2044 = vrcp.f32 %v1390_v47 }
 0xccf   :  { %2046 = vtanh.f32 %v1307_v36 }
 0xcd2   :  { %v2041_v49 = vpop.eup %2040 }
 0xcd3   :  { %v1314_v35 = vadd.f32 1.0, %v2041_v49  ;;  %v2043_v37 = vpop.eup %2042 }
 0xcd5   :  { %2048 = vrcp.f32 %v1314_v35 }
 0xcd6   :  { %2050 = vpow2.f32 %v1824_v62 }
 0xcd8   :  { %v2045_v41 = vpop.eup %2044 }
 0xcd9   :  { %v1401_v53 = vmul.f32 %v2045_v41, %v2043_v37  ;;  %v2047_v42 = vpop.eup %2046  ;;  %v1400_v46 = vmul.f32 %v2045_v41, %v2780_v23 }
 0xcdb   :  { %1403 = vrot.lane.b32.xlu1 %v1401_v53, %s2252_s4 }
 0xcdf   :  { %v2049_v20 = vpop.eup %2048 }
 0xce0   :  { %v1325_v24 = vmul.f32 %v2049_v20, %v2047_v42  ;;  %v2051_v45 = vpop.eup %2050  ;;  %v1324_v10 = vmul.f32 %v2049_v20, %v2786_v52 }
 0xce1   :  { %v1397_v44 = vadd.f32 1.0, %v2051_v45 }
 0xce2   :  { %1327 = vrot.lane.b32.xlu1 %v1325_v24, %s2252_s4 }
 0xce3   :  { %2052 = vrcp.f32 %v1397_v44 }
 0xced   :  { %v2053_v54 = vpop.eup %2052 }
 0xd4d   :  { %v1404_v30 = vpop.permute.xlu1 %1403 }
 0xd4e   :  { %v2853_v51 = vadd.f32 %v1404_v30, %v1400_v46 }
 0xd50   :  { %2054 = vtanh.f32 %v2853_v51 }
 0xd51   :  { %2056 = vpow2.f32 %v1821_v63 }
 0xd54   :  { %v1328_v9 = vpop.permute.xlu1 %1327 }
 0xd55   :  { %v2859_v4 = vadd.f32 %v1328_v9, %v1324_v10 }
 0xd57   :  { %2058 = vtanh.f32 %v2859_v4 }
 0xd5a   :  { %v2055_v57 = vpop.eup %2054 }
 0xd5b   :  { %v1408_v60 = vmul.f32 %v2055_v57, %v2053_v54  ;;  %v2057_v23 = vpop.eup %2056 }
 0xd5c   :  { %v1321_v55 = vadd.f32 1.0, %v2057_v23 }
 0xd5d   :  { %v1482_v61 = vpack.c.bf16 %v1408_v60, %v1408_v60 }
 0xd5e   :  { %2060 = vrcp.f32 %v1321_v55 }
 0xd5f   :  { %1484 = vrot.lane.b32.xlu0 %v1482_v61, %s2252_s4 }
 0xd61   :  { %v2059_v3 = vpop.eup %2058 }
 0xd63   :  { %1410 = vrot.lane.b32.xlu0 %v1408_v60, %s2252_s4 }
 0xd68   :  { %v2061_v39 = vpop.eup %2060 }
 0xd69   :  { %v1332_v16 = vmul.f32 %v2061_v39, %v2059_v3 }
 0xdd1   :  { %v1485_v15 = vpop.permute.xlu0 %1484 }
 0xdd2   :  { %1827 = vmatmul.mubr.msk.bf16.vlgmr.msra.gmra.mrb[24].mxu1 %vm92_vm0, %v1485_v15 }
 0xdd3   :  { %1561 = vmatpush1.bf16.msra.mxu1 %v2790_v0  ;;  %1592 = vmatprep.mubr.bf16.mxu1 %v2250_v1  ;;  %v1480_v1 = vunpack.c.l.bf16 %v2547_v38 }
 0xdd4   :  { %1562 = vmatprep.subr.bf16.mxu1 %v2794_v56  ;;  %v1481_v56 = vunpack.c.h.bf16 %v2547_v38 }
 0xdd5   :  { %v1411_v52 = vpop.permute.xlu0 %1410 }
 0xdd6   :  { %v1413_v5 = vsel %vm92_vm0, %v1411_v52, %v1332_v16 }
 0xdd7   :  { %v1414_v50 = vpack.c.bf16 %v1413_v5, %v1413_v5  ;;  %1563 = vmatpush1.bf16.msra.mxu1 %v2798_v58 }
 0xdd8   :  { %1564 = vmatprep.subr.bf16.mxu1 %v2801_v7 }
 0xdd9   :  { %1448 = vmatmul.mubr.bf16.vlgmr.msra.gmra.mrb[44].mxu0 %v1414_v50 }
 0xddb   :  { %1565 = vmatpush1.bf16.msra.mxu1 %v2806_v59 }
 0xddc   :  { %1566 = vmatprep.subr.bf16.mxu1 %v2810_v8 }
 0xddf   :  { %1567 = vmatpush1.bf16.msra.mxu1 %v2814_v11 }
 0xde0   :  { %1568 = vmatprep.subr.bf16.mxu1 %v2818_v43 }
 0xde3   :  { %1569 = vmatpush1.bf16.msra.mxu1 %v2822_v12 }
 0xde4   :  { %1570 = vmatprep.subr.bf16.mxu1 %v2826_v14 }
 0xde7   :  { %1571 = vmatpush1.bf16.msra.mxu1 %v2830_v17 }
 0xde8   :  { %1572 = vmatprep.subr.bf16.mxu1 %v2834_v18 }
 0xdeb   :  { %1573 = vmatpush1.bf16.msra.mxu1 %v2837_v31 }
 0xdec   :  { %1574 = vmatprep.subr.bf16.mxu1 %v2840_v32 }
 0xdef   :  { %1575 = vmatpush1.bf16.msra.mxu1 %v2843_v13 }
 0xdf0   :  { %1845 = vmatprep.subr.mxu1 %v2251_v2 }
 0xea5   :  { %v1523_v0 = vpop.f32.mrb[24].mxu1 }
 0xea6   :  { %v1530_v58 = vadd.f32 %v1523_v0, %v1480_v1  ;;  %v1525_v7 = vpop.f32.mrb[25].mxu1 }
 0xea7   :  { %v1531_v59 = vadd.f32 %v1525_v7, %v1481_v56  ;;  %v1527_v8 = vpop.f32.mrb[26].mxu1 }
 0xea8   :  { %v1828_v11 = vmul.f32 -1.442695, %v1530_v58  ;;  %v1528_v43 = vpop.f32.mrb[27].mxu1 }
 0xea9   :  { %v1829_v34 = vmul.f32 -1.442695, %v1531_v59 }
 0xeaa   :  { %2062 = vpow2.f32 %v1828_v11 }
 0xeac   :  { %v1449_v12 = vpop.f32.mrb[44].mxu0 }
 0xead   :  { %v1450_v14 = vadd.f32 %v1449_v12, %v2603_v48  ;;  %v1451_v17 = vpop.f32.mrb[45].mxu0 }
 0xeae   :  { %v1453_v18 = vpop.f32.mrb[46].mxu0  ;;  %v1452_v38 = vadd.f32 %v1451_v17, %v2610_v29 }
 0xeaf   :  { %v1825_v31 = vmul.f32 -1.442695, %v1450_v14  ;;  %v1454_v32 = vpop.f32.mrb[47].mxu0 }
 0xeb0   :  { %v1826_v20 = vmul.f32 -1.442695, %v1452_v38 }
 0xeb1   :  { %2064 = vpow2.f32 %v1825_v31 }
 0xeb2   :  { %2066 = vtanh.f32 %v1531_v59 }
 0xeb4   :  { %v2063_v13 = vpop.eup %2062 }
 0xeb5   :  { %v1535_v22 = vadd.f32 1.0, %v2063_v13 }
 0xeb7   :  { %2068 = vrcp.f32 %v1535_v22 }
 0xeb8   :  { %2070 = vtanh.f32 %v1452_v38 }
 0xebb   :  { %v2065_v6 = vpop.eup %2064 }
 0xebc   :  { %v1459_v26 = vadd.f32 1.0, %v2065_v6  ;;  %v2067_v19 = vpop.eup %2066 }
 0xebe   :  { %2072 = vrcp.f32 %v1459_v26 }
 0xebf   :  { %2074 = vpow2.f32 %v1829_v34 }
 0xec1   :  { %v2069_v40 = vpop.eup %2068 }
 0xec2   :  { %v1546_v27 = vmul.f32 %v2069_v40, %v2067_v19  ;;  %v2071_v28 = vpop.eup %2070  ;;  %v1545_v49 = vmul.f32 %v2069_v40, %v2853_v51 }
 0xec4   :  { %1548 = vrot.lane.b32.xlu1 %v1546_v27, %s2252_s4 }
 0xec8   :  { %v2073_v25 = vpop.eup %2072 }
 0xec9   :  { %v1470_v33 = vmul.f32 %v2073_v25, %v2071_v28  ;;  %v2075_v47 = vpop.eup %2074  ;;  %v1469_v62 = vmul.f32 %v2073_v25, %v2859_v4 }
 0xeca   :  { %v1542_v36 = vadd.f32 1.0, %v2075_v47 }
 0xecb   :  { %1472 = vrot.lane.b32.xlu0 %v1470_v33, %s2252_s4 }
 0xecc   :  { %2076 = vrcp.f32 %v1542_v36 }
 0xed6   :  { %v2077_v41 = vpop.eup %2076 }
 0xf36   :  { %v1549_v35 = vpop.permute.xlu1 %1548 }
 0xf37   :  { %v1551_v37 = vadd.f32 %v1549_v35, %v1545_v49 }
 0xf39   :  { %2078 = vtanh.f32 %v1551_v37 }
 0xf3a   :  { %2080 = vpow2.f32 %v1826_v20 }
 0xf3d   :  { %v1473_v24 = vpop.permute.xlu0 %1472 }
 0xf3e   :  { %v1475_v44 = vadd.f32 %v1473_v24, %v1469_v62 }
 0xf40   :  { %2082 = vtanh.f32 %v1475_v44 }
 0xf43   :  { %v2079_v53 = vpop.eup %2078 }
 0xf44   :  { %v1553_v42 = vmul.f32 %v2079_v53, %v2077_v41  ;;  %v2081_v45 = vpop.eup %2080 }
 0xf45   :  { %v1466_v46 = vadd.f32 1.0, %v2081_v45 }
 0xf46   :  { %1555 = vrot.lane.b32.xlu1 %v1553_v42, %s2252_s4 }
 0xf47   :  { %2084 = vrcp.f32 %v1466_v46 }
 0xf4a   :  { %v2083_v30 = vpop.eup %2082 }
 0xf51   :  { %v2085_v51 = vpop.eup %2084 }
 0xf52   :  { %v1477_v54 = vmul.f32 %v2085_v51, %v2083_v30 }
 0xfb8   :  { %v1556_v57 = vpop.permute.xlu1 %1555 }
 0xfb9   :  { %v1558_v60 = vsel %vm92_vm0, %v1556_v57, %v1477_v54  ;;  %1623 = vst.msk [vmem:[#allocation3] sm:$0xff] %vm92_vm0, %v1556_v57 }
 0xfba   :  { %v1559_v61 = vpack.c.bf16 %v1558_v60, %v1558_v60 }
 0xfbc   :  { %1593 = vmatmul.mubr.bf16.vlgmr.msra.gmra.mrb[28].mxu1 %v1559_v61 }
 0xfbd   :  { %1847 = vmatprep.mubr.msk.f32.mxu1 %vm2253_vm2, %v2251_v2  ;;  %v1642_v2 = vld [vmem:[%s2926_s6] sm:$0xff]  ;;  %s2254_s6 = smov [#allocation13]  }
 0xfbe   :  { %s1743_s12 = sshll.u32 %s2254_s6, 4  ;;  %s1744_s12 = int_to_ptr.vmem [resolvable:$true] %s1743_s12 }
 0xfbf   :  { %s2214_s13 = scalar_lea.vmem %s1744_s12, 16  ;;  %s2218_s14 = scalar_lea.vmem %s1744_s12, 32 }
 0xfc0   :  { %p2215_p4 = scmp.ne.s32.totalorder %s1744_s12, %s2214_s13  ;;  %p2219_p5 = scmp.lt.s32.totalorder %s1744_s12, %s1744_s12 }
 0xfc1   :  { %p2220_p6 = scmp.lt.s32.totalorder %s2218_s14, %s2214_s13 }
 0xfc3   :  { %p2221_p7 = por %p2220_p6, %p2219_p5 }
 0xfc5   :  { %p2222_p8 = pnand %p2221_p7, %p2215_p4 }
0x108f   :  { %v1594_v63 = vpop.f32.mrb[28].mxu1 }
0x1090   :  { %v1595_v9 = vadd.f32 %v1594_v63, %v2603_v48  ;;  %v1596_v10 = vpop.f32.mrb[29].mxu1 }
0x1091   :  { %v1598_v23 = vpop.f32.mrb[30].mxu1  ;;  %v1597_v3 = vadd.f32 %v1596_v10, %v2610_v29  ;;  %v1718_v29 = vld [vmem:[#allocation4] sm:$0x1] }
0x1092   :  { %v1830_v4 = vmul.f32 -1.442695, %v1595_v9  ;;  %v1599_v55 = vpop.f32.mrb[31].mxu1 }
0x1093   :  { %v1831_v50 = vmul.f32 -1.442695, %v1597_v3 }
0x1094   :  { %2086 = vpow2.f32 %v1830_v4 }
0x1095   :  { %2088 = vtanh.f32 %v1597_v3 }
0x109e   :  { %v2087_v15 = vpop.eup %2086 }
0x109f   :  { %v1604_v39 = vadd.f32 1.0, %v2087_v15  ;;  %v2089_v16 = vpop.eup %2088 }
0x10a1   :  { %2090 = vrcp.f32 %v1604_v39 }
0x10a2   :  { %2092 = vpow2.f32 %v1831_v50 }
0x10ab   :  { %v2091_v52 = vpop.eup %2090 }
0x10ac   :  { %v1615_v5 = vmul.f32 %v2091_v52, %v2089_v16  ;;  %v2093_v1 = vpop.eup %2092  ;;  %v1614_v0 = vmul.f32 %v2091_v52, %v1475_v44 }
0x10ad   :  { %v1611_v48 = vadd.f32 1.0, %v2093_v1 }
0x10ae   :  { %1617 = vrot.lane.b32.xlu0 %v1615_v5, %s2252_s4 }
0x10af   :  { %2094 = vrcp.f32 %v1611_v48 }
0x10b2   :  { %1721 = vperm.xlu0 %1866, %v1718_v29  }
0x10b9   :  { %v2095_v7 = vpop.eup %2094 }
0x1120   :  { %v1618_v56 = vpop.permute.xlu0 %1617 }
0x1121   :  { %v1620_v58 = vadd.f32 %v1618_v56, %v1614_v0 }
0x1123   :  { %2096 = vtanh.f32 %v1620_v58 }
0x112d   :  { %v2097_v59 = vpop.eup %2096 }
0x112e   :  { %v1622_v8 = vmul.f32 %v2097_v59, %v2095_v7 }
0x1130   :  { %1630 = vrot.lane.b32.xlu1 %v1622_v8, %s2252_s4 }
0x1131   :  { %v1722_v14 = vpop.permute.xlu0 %1721 }
0x1132   :  { %v1727_v17 = vrot.slane %v1722_v14, %v2420_v21 }
0x1134   :  { %1625 = vrot.lane.b32.xlu1 %v1551_v37, %s2252_s4 }
0x1138   :  { %1635 = vrot.lane.b32.xlu1 %v1620_v58, %s2252_s4 }
0x11a2   :  { %v1631_v11 = vpop.permute.xlu1 %1630 }
0x11a3   :  { %1633 = vst.msk [vmem:[#allocation3 + $0x10] sm:$0xff] %vm92_vm0, %v1631_v11  ;;  %1846 = vmatpush3.xpose.msk.msra.mxu1 %vm92_vm0, %v1631_v11 }
0x11a6   :  { %v1626_v43 = vpop.permute.xlu1 %1625  ;;  %1848 = vmatmul.mubr.msk.f32.vlgmr.msra.gmra.mrb[32].mxu1 %vm92_vm0, %v1642_v2 }
0x11a7   :  { %1628 = vst.msk [vmem:[#allocation3 + $0x8] sm:$0xff] %vm92_vm0, %v1626_v43 }
0x11aa   :  { %v1636_v12 = vpop.permute.xlu1 %1635 }
0x11ab   :  { %1638 = vst.msk [vmem:[#allocation3 + $0x18] sm:$0xff] %vm92_vm0, %v1636_v12 }
0x1279   :  { %v1714_v18 = vpop.f32.mrb[32].mxu1 }
0x127a   :  { %v1728_v31 = vadd.f32 %v1727_v17, %v1714_v18  ;;  %v1849_v32 = vpop.f32.mrb[33].mxu1 }
0x127c   :  { %v1834_v13 = vmul.f32 -1.442695, %v1728_v31 }
0x127e   :  { %2098 = vpow2.f32 %v1834_v13 }
0x1288   :  { %v2099_v22 = vpop.eup %2098 }
0x1289   :  { %v1732_v38 = vadd.f32 1.0, %v2099_v22 }
0x128b   :  { %2100 = vrcp.f32 %v1732_v38 }
0x1295   :  { %v2101_v6 = vpop.eup %2100 }
0x1296   :  { %1736 = vst.msk [vmem:[#allocation13] sm:$0x1] %vm1735_vm3, %v2101_v6 }
0x1297   :  { %2225 = shalt.err (!%p2222_p8)
}
0x1298   :  { %s2226_s16 = scalar_lea.hbm %s2928_s8, 16 }
0x1299   :  { %p2227_p9 = scmp.ne.s32.totalorder %s2928_s8, %s2226_s16  ;;  %p2230_p10 = scmp.lt.u32.totalorder %s2226_s16, %s2928_s8 }
0x129b   :  { %p2232_p11 = pnand %p2230_p10, %p2227_p9 }
0x129d   :  { %2235 = shalt.err (!%p2232_p11)
}
0x129e   :  { %1746 = dma.vmem_to_hbm [thread:$0]  %s1744_s12, 16, %s2928_s8, [#allocation7]  }
0x129f   :  { %2242 = dma.done.wait [#allocation7], 16  }
0x12a0   :  { %2243 = vsyncadd [#allocation7], 4294967280 }
0x12a1   :  { %1750 = vsyncpa [#allocation6], 1 }
0x12a2   :  { %1751 = vsyncpa [#allocation9], 1 }
0x12a3   :  { %1752 = vsyncpa [#allocation12], 1 }
0x12a4   :  { %1753 = vsyncpa [#allocation7], 1 }

</bundles_post_ra>
